<compile_context>
chip_gen: v7x
topology: tpu7x:2x2x1
jax: 0.10.0
libtpu: 0.0.40
codegen_flags: <defaults>
</compile_context>

<pallas_src>
import jax
import jax.numpy as jnp
from jax.experimental import pallas as pl
from jax.experimental.pallas import tpu as pltpu

HIDDEN = 32
NUM_HEADS = 4
D_K = HIDDEN // NUM_HEADS
HEADS_PAD = 8          # pad heads to one full sublane tile -> free reshapes
REPR_IN = 53
REPR_HID = 32
LN_EPS = 1e-5


# ----------------------------------------------------------------------------
# Fused kernel: repr MLP + mask + softmax + attention + out proj + residual +
# LayerNorm.  grid = (B, num_query_tiles), fully parallel.
# ----------------------------------------------------------------------------
def _fused_kernel(x_ref, val_ref, vmean_ref, rcf_ref, kmask_ref, alive_ref,
                  w1b_ref, b1_ref, w2b_ref, b2_ref, hm_ref,
                  wo_ref, bo_ref, g_ref, bt_ref, out_ref):
    TQ = rcf_ref.shape[0]
    L = rcf_ref.shape[2]
    HP = w2b_ref.shape[1]
    HID = wo_ref.shape[0]

    # --- repr MLP: per-query logits for all (padded) heads, keys on lanes ---
    rcf = rcf_ref[...]                                                # (TQ,53,L) bf16
    hdn = jnp.einsum("qjc,qck->qjk", w1b_ref[...], rcf,
                     preferred_element_type=jnp.float32)              # (TQ,32,L) f32
    hdn = jnp.maximum(hdn + b1_ref[...], 0.0).astype(jnp.bfloat16)
    s = jnp.einsum("qhj,qjk->qhk", w2b_ref[...], hdn,
                   preferred_element_type=jnp.float32) + b2_ref[...]  # (TQ,HP,L) f32

    # --- key mask + numerically-safe softmax over keys -----------------------
    s = jnp.where(kmask_ref[...] > 0.5, s, -jnp.inf)
    mx = jnp.maximum(jnp.max(s, axis=-1, keepdims=True), -1e30)       # guard all--inf rows
    ex = jnp.exp(s - mx)
    denom = jnp.maximum(jnp.sum(ex, axis=-1, keepdims=True), 1e-30)
    p = (ex * (1.0 / denom)).astype(jnp.bfloat16)                     # exact divide (tiny)

    # --- attention: one flattened matmul, M = TQ*HP (free reshape, HP == 8) --
    ctx_all = jnp.dot(p.reshape(TQ * HP, L), val_ref[...],
                      preferred_element_type=jnp.float32)             # (TQ*HP, 32)
    ctx = jnp.sum(ctx_all.reshape(TQ, HP, HID) * hm_ref[...], axis=1) # (TQ, 32)

    # --- dead query rows (torch all_inf_rows -> uniform attention) ----------
    ctx = jnp.where(alive_ref[...] < 0.5, vmean_ref[...], ctx)        # (TQ, 32)

    # --- output projection + residual + LayerNorm (2-D epilogue) ------------
    y = x_ref[...] + jnp.dot(ctx, wo_ref[...],
                             preferred_element_type=jnp.float32) + bo_ref[...]
    mu = jnp.mean(y, axis=-1, keepdims=True)
    var = jnp.mean((y - mu) ** 2, axis=-1, keepdims=True)
    out_ref[...] = (y - mu) * jax.lax.rsqrt(var + LN_EPS) * g_ref[...] + bt_ref[...]


# ----------------------------------------------------------------------------
# Generation-aware tile / VMEM-limit selection.
# ----------------------------------------------------------------------------
def _round_up(x, m):
    return ((x + m - 1) // m) * m


def _choose_tile(Lq, Lk, batch):
    lk_pad = _round_up(Lk, 128)
    # Per-query-row VMEM bytes while one tile is in flight (worst case):
    #   refCov tile (bf16, 53->56 sublanes, double-buffered) : 2*56*lk*2
    #   hdn f32 + bf16                                        : 32*lk*(4+2)
    #   logits / exp / probs (HP=8 heads)                     : 8*lk*(3*4+2)
    #   tiled repr weights (lane-padded, double-buffered)     : 2*(32+8)*128*2
    per_q = (2 * 56 * lk_pad * 2 + 32 * lk_pad * 6 + 8 * lk_pad * 14
             + 2 * (REPR_HID + HEADS_PAD) * 128 * 2)
    try:
        info = pltpu.get_tpu_info()
        cap = int(getattr(info, "vmem_capacity_bytes", 64 * 1024 * 1024))
    except Exception:
        cap = 64 * 1024 * 1024                       # v7x-sized fallback: safe everywhere
    budget = int(0.70 * cap)
    fixed = 2 * lk_pad * 128 * 2 + 4 * 1024 * 1024   # value stream + misc blocks headroom
    tq = ((budget - fixed) // per_q) // 8 * 8
    tq = max(8, min(tq, _round_up(Lq, 8), 512))
    if batch == 1 and Lq >= 16:                      # keep >=2 grid steps for v7x's 2 TCs
        tq = max(8, min(tq, _round_up((Lq + 1) // 2, 8)))
    vmem_limit = min(int(0.85 * cap), 100 * 1024 * 1024)
    return tq, vmem_limit


# ----------------------------------------------------------------------------
# Wrapper
# ----------------------------------------------------------------------------
def attention_block_disable_qk(x, refCov, mask, params):
    B, L, h = x.shape
    assert h == HIDDEN and h == NUM_HEADS * D_K
    Wv, bv, W1, b1, W2, b2, Wo, bo, gamma, beta = params

    TQ, vmem_limit = _choose_tile(L, L, B)
    Lq = _round_up(L, TQ)
    n_qt = Lq // TQ

    # ---- hoisted compute + layout plumbing (one-shot XLA work) -------------
    value = x @ Wv + bv                                          # (B,L,h) f32
    vmean = jnp.mean(value, axis=1, keepdims=True)               # (B,1,h) dead-row fixup
    value_bf = value.astype(jnp.bfloat16)

    rcf = jnp.transpose(refCov, (0, 1, 3, 2)).astype(jnp.bfloat16)   # (B,L,53,L) keys->lanes
    maskf = mask.astype(jnp.float32)
    kmask = maskf.reshape(B, 1, 1, L)
    anyk = (jnp.sum(maskf, axis=1, keepdims=True) > 0.5).astype(jnp.float32)
    alive = (maskf * anyk).reshape(B, L, 1)                      # query alive & some valid key

    x_r = x
    if Lq != L:                                                  # pad query axis to TQ mult.
        pad = Lq - L
        x_r = jnp.pad(x, ((0, 0), (0, pad), (0, 0)))
        rcf = jnp.pad(rcf, ((0, 0), (0, pad), (0, 0), (0, 0)))
        alive = jnp.pad(alive, ((0, 0), (0, pad), (0, 0)))

    # Repr-MLP weights, tiled once (no per-step in-kernel broadcast), heads padded to 8.
    w1b = jnp.tile(W1.T.astype(jnp.bfloat16)[None], (TQ, 1, 1))              # (TQ,32,53)
    w2p = jnp.zeros((HEADS_PAD, REPR_HID), jnp.float32).at[:NUM_HEADS].set(W2.T)
    w2b = jnp.tile(w2p.astype(jnp.bfloat16)[None], (TQ, 1, 1))               # (TQ,8,32)
    b1r = b1.reshape(1, REPR_HID, 1)
    b2p = jnp.zeros((1, HEADS_PAD, 1), jnp.float32).at[0, :NUM_HEADS, 0].set(b2[0])
    hm = jnp.repeat(jnp.eye(NUM_HEADS, dtype=jnp.float32), D_K, axis=1)      # (4,32)
    hm8 = jnp.zeros((HEADS_PAD, HIDDEN), jnp.float32).at[:NUM_HEADS].set(hm)[None]
    bor = bo.reshape(1, HIDDEN)
    gr = gamma.reshape(1, HIDDEN)
    br = beta.reshape(1, HIDDEN)

    const = lambda shape: pl.BlockSpec(shape, lambda b, q: (0,) * len(shape))

    out = pl.pallas_call(
        _fused_kernel,
        out_shape=jax.ShapeDtypeStruct((B, Lq, HIDDEN), jnp.float32),
        grid=(B, n_qt),
        in_specs=[
            pl.BlockSpec((None, TQ, HIDDEN), lambda b, q: (b, q, 0)),        # residual tile
            pl.BlockSpec((None, L, HIDDEN), lambda b, q: (b, 0, 0)),         # value (all keys)
            pl.BlockSpec((None, 1, HIDDEN), lambda b, q: (b, 0, 0)),         # key-mean of value
            pl.BlockSpec((None, TQ, REPR_IN, L), lambda b, q: (b, q, 0, 0)), # refCov^T tile
            pl.BlockSpec((None, 1, 1, L), lambda b, q: (b, 0, 0, 0)),        # key mask
            pl.BlockSpec((None, TQ, 1), lambda b, q: (b, q, 0)),             # query-alive flag
            const(w1b.shape), const(b1r.shape),
            const(w2b.shape), const(b2p.shape),
            const(hm8.shape),
            const(Wo.shape), const(bor.shape),
            const(gr.shape), const(br.shape),
        ],
        out_specs=pl.BlockSpec((None, TQ, HIDDEN), lambda b, q: (b, q, 0)),
        compiler_params=pltpu.CompilerParams(
            dimension_semantics=("parallel", "parallel"),
            vmem_limit_bytes=vmem_limit,
        ),
    )(x_r, value_bf, vmean, rcf, kmask, alive,
      w1b, b1r, w2b, b2p, hm8, Wo, bor, gr, br)
    return out[:, :L, :]


# ----------------------------------------------------------------------------
# Deterministic parameter init (weights stored as (in, out); y = x @ W + b)
# ----------------------------------------------------------------------------
def init_params(key):
    ks = jax.random.split(key, 10)
    nrm = lambda k, s, scale=0.1: scale * jax.random.normal(k, s, jnp.float32)
    Wv = nrm(ks[0], (HIDDEN, HIDDEN))
    bv = nrm(ks[1], (1, HIDDEN))
    W1 = nrm(ks[2], (REPR_IN, REPR_HID))
    b1 = nrm(ks[3], (1, REPR_HID))
    W2 = nrm(ks[4], (REPR_HID, NUM_HEADS))
    b2 = nrm(ks[5], (1, NUM_HEADS))
    Wo = nrm(ks[6], (HIDDEN, HIDDEN))
    bo = nrm(ks[7], (1, HIDDEN))
    gamma = 1.0 + nrm(ks[8], (1, HIDDEN))
    beta = nrm(ks[9], (1, HIDDEN))
    return (Wv, bv, W1, b1, W2, b2, Wo, bo, gamma, beta)


# ----------------------------------------------------------------------------
# Pure-JAX reference of the PyTorch forward (f32, for validation)
# ----------------------------------------------------------------------------
def reference_forward(x, refCov, mask, params):
    Wv, bv, W1, b1, W2, b2, Wo, bo, gamma, beta = params
    B, L, h = x.shape
    H, dk = NUM_HEADS, D_K
    value = x @ Wv + bv
    vh = value.reshape(B, L, H, dk).transpose(0, 2, 1, 3)        # (B,H,L,dk)
    rw = jnp.maximum(refCov @ W1 + b1, 0.0) @ W2 + b2            # (B,L,L,H)
    rw = rw.transpose(0, 3, 1, 2)                                # (B,H,L,L)
    m2 = (mask[:, :, None] * mask[:, None, :]) > 0               # (B,L,L)
    rw = jnp.where(m2[:, None, :, :], rw, -jnp.inf)
    all_inf = jnp.all(rw == -jnp.inf, axis=-1, keepdims=True)
    rw = jnp.where(all_inf, 0.0, rw)
    p = jax.nn.softmax(rw, axis=-1)
    out = jnp.einsum("bhqk,bhkd->bhqd", p, vh)
    out = out.transpose(0, 2, 1, 3).reshape(B, L, h)
    out = out @ Wo + bo
    y = x + out
    mu = jnp.mean(y, axis=-1, keepdims=True)
    var = jnp.mean((y - mu) ** 2, axis=-1, keepdims=True)
    return (y - mu) / jnp.sqrt(var + LN_EPS) * gamma + beta


if __name__ == "__main__":
    B, L = 2, 8
    key = jax.random.PRNGKey(0)
    k_x, k_rc, k_p = jax.random.split(key, 3)
    x = jax.random.normal(k_x, (B, L, HIDDEN), jnp.float32)
    refCov = jax.random.normal(k_rc, (B, L, L, REPR_IN), jnp.float32)
    mask = jnp.array([[1, 1, 1, 1, 1, 1, 0, 0],
                      [1, 1, 1, 1, 1, 1, 1, 1]], dtype=jnp.int32)
    params = init_params(k_p)

    out = attention_block_disable_qk(x, refCov, mask, params)
    out = jax.block_until_ready(out)

    ref = reference_forward(x, refCov, mask, params)
    assert out.shape == (B, L, HIDDEN)
    max_err = float(jnp.max(jnp.abs(out - ref)))
    # bf16 refCov / probs / value streams -> slightly looser tolerance vs f32 ref.
    assert jnp.allclose(out, ref, atol=3e-2, rtol=3e-2), f"max_err={max_err}"
    print("KERNEL_OK")
</pallas_src>

<mosaic_0001>
module attributes {stable_mosaic.version = 11 : i64} {
  func.func @_fused_kernel(%arg0: i32, %arg1: i32, %arg2: memref<1x8x32xf32, #tpu.memory_space<vmem>>, %arg3: memref<1x8x32xbf16, #tpu.memory_space<vmem>>, %arg4: memref<1x1x32xf32, #tpu.memory_space<vmem>>, %arg5: memref<1x8x53x8xbf16, #tpu.memory_space<vmem>>, %arg6: memref<1x1x1x8xf32, #tpu.memory_space<vmem>>, %arg7: memref<1x8x1xf32, #tpu.memory_space<vmem>>, %arg8: memref<8x32x53xbf16, #tpu.memory_space<vmem>>, %arg9: memref<1x32x1xf32, #tpu.memory_space<vmem>>, %arg10: memref<8x8x32xbf16, #tpu.memory_space<vmem>>, %arg11: memref<1x8x1xf32, #tpu.memory_space<vmem>>, %arg12: memref<1x8x32xf32, #tpu.memory_space<vmem>>, %arg13: memref<32x32xf32, #tpu.memory_space<vmem>>, %arg14: memref<1x32xf32, #tpu.memory_space<vmem>>, %arg15: memref<1x32xf32, #tpu.memory_space<vmem>>, %arg16: memref<1x32xf32, #tpu.memory_space<vmem>>, %arg17: memref<1x8x32xf32, #tpu.memory_space<vmem>>) attributes {dimension_semantics = [#tpu.dimension_semantics<parallel>, #tpu.dimension_semantics<parallel>], iteration_bounds = array<i64: 2, 1>, scalar_prefetch = 0 : i64, scratch_operands = 0 : i64, tpu.core_type = #tpu.core_type<tc>, window_params = [{transform_indices = @transform_0, window_bounds = array<i64: 1, 8, 32>}, {transform_indices = @transform_1, window_bounds = array<i64: 1, 8, 32>}, {transform_indices = @transform_2, window_bounds = array<i64: 1, 1, 32>}, {transform_indices = @transform_3, window_bounds = array<i64: 1, 8, 53, 8>}, {transform_indices = @transform_4, window_bounds = array<i64: 1, 1, 1, 8>}, {transform_indices = @transform_5, window_bounds = array<i64: 1, 8, 1>}, {pipeline_mode = #tpu.pipeline_mode<synchronous>, transform_indices = @transform_6, window_bounds = array<i64: 8, 32, 53>}, {pipeline_mode = #tpu.pipeline_mode<synchronous>, transform_indices = @transform_7, window_bounds = array<i64: 1, 32, 1>}, {pipeline_mode = #tpu.pipeline_mode<synchronous>, transform_indices = @transform_8, window_bounds = array<i64: 8, 8, 32>}, {pipeline_mode = #tpu.pipeline_mode<synchronous>, transform_indices = @transform_9, window_bounds = array<i64: 1, 8, 1>}, {pipeline_mode = #tpu.pipeline_mode<synchronous>, transform_indices = @transform_10, window_bounds = array<i64: 1, 8, 32>}, {pipeline_mode = #tpu.pipeline_mode<synchronous>, transform_indices = @transform_11, window_bounds = array<i64: 32, 32>}, {pipeline_mode = #tpu.pipeline_mode<synchronous>, transform_indices = @transform_12, window_bounds = array<i64: 1, 32>}, {pipeline_mode = #tpu.pipeline_mode<synchronous>, transform_indices = @transform_13, window_bounds = array<i64: 1, 32>}, {pipeline_mode = #tpu.pipeline_mode<synchronous>, transform_indices = @transform_14, window_bounds = array<i64: 1, 32>}, {transform_indices = @transform_15, window_bounds = array<i64: 1, 8, 32>}]} {
    %c0 = arith.constant 0 : index
    %c0_0 = arith.constant 0 : index
    %c0_1 = arith.constant 0 : index
    %c0_2 = arith.constant 0 : index
    %0 = vector.load %arg5[%c0, %c0_0, %c0_1, %c0_2] : memref<1x8x53x8xbf16, #tpu.memory_space<vmem>>, vector<1x8x53x8xbf16>
    %1 = vector.shape_cast %0 : vector<1x8x53x8xbf16> to vector<8x53x8xbf16>
    %c0_3 = arith.constant 0 : index
    %c0_4 = arith.constant 0 : index
    %c0_5 = arith.constant 0 : index
    %2 = vector.load %arg8[%c0_3, %c0_4, %c0_5] : memref<8x32x53xbf16, #tpu.memory_space<vmem>>, vector<8x32x53xbf16>
    "tpu.trace_start"() <{level = 10 : i32, message = "qjc,qck->qjk"}> : () -> ()
    %cst = arith.constant dense<0.000000e+00> : vector<8x32x8xf32>
    %3 = tpu.matmul %2, %1, %cst {dimension_numbers = #tpu.dot_dimension_numbers<[2], [1], [1], [2], [0, 0, 0, 1, 1, 2], [0], [0]>} : vector<8x32x53xbf16>, vector<8x53x8xbf16>, vector<8x32x8xf32> -> vector<8x32x8xf32>
    "tpu.trace_stop"() : () -> ()
    %c0_6 = arith.constant 0 : index
    %c0_7 = arith.constant 0 : index
    %c0_8 = arith.constant 0 : index
    %4 = vector.load %arg9[%c0_6, %c0_7, %c0_8] : memref<1x32x1xf32, #tpu.memory_space<vmem>>, vector<1x32x1xf32>
    %5 = vector.broadcast %4 : vector<1x32x1xf32> to vector<8x32x8xf32>
    %6 = arith.addf %3, %5 : vector<8x32x8xf32>
    %cst_9 = arith.constant 0.000000e+00 : f32
    %7 = vector.broadcast %cst_9 : f32 to vector<8x32x8xf32>
    %8 = arith.maximumf %6, %7 : vector<8x32x8xf32>
    %9 = arith.truncf %8 : vector<8x32x8xf32> to vector<8x32x8xbf16>
    %c0_10 = arith.constant 0 : index
    %c0_11 = arith.constant 0 : index
    %c0_12 = arith.constant 0 : index
    %10 = vector.load %arg10[%c0_10, %c0_11, %c0_12] : memref<8x8x32xbf16, #tpu.memory_space<vmem>>, vector<8x8x32xbf16>
    "tpu.trace_start"() <{level = 10 : i32, message = "qhj,qjk->qhk"}> : () -> ()
    %cst_13 = arith.constant dense<0.000000e+00> : vector<8x8x8xf32>
    %11 = tpu.matmul %10, %9, %cst_13 {dimension_numbers = #tpu.dot_dimension_numbers<[2], [1], [1], [2], [0, 0, 0, 1, 1, 2], [0], [0]>} : vector<8x8x32xbf16>, vector<8x32x8xbf16>, vector<8x8x8xf32> -> vector<8x8x8xf32>
    "tpu.trace_stop"() : () -> ()
    %c0_14 = arith.constant 0 : index
    %c0_15 = arith.constant 0 : index
    %c0_16 = arith.constant 0 : index
    %12 = vector.load %arg11[%c0_14, %c0_15, %c0_16] : memref<1x8x1xf32, #tpu.memory_space<vmem>>, vector<1x8x1xf32>
    %13 = vector.broadcast %12 : vector<1x8x1xf32> to vector<8x8x8xf32>
    %14 = arith.addf %11, %13 : vector<8x8x8xf32>
    %c0_17 = arith.constant 0 : index
    %c0_18 = arith.constant 0 : index
    %c0_19 = arith.constant 0 : index
    %c0_20 = arith.constant 0 : index
    %15 = vector.load %arg6[%c0_17, %c0_18, %c0_19, %c0_20] : memref<1x1x1x8xf32, #tpu.memory_space<vmem>>, vector<1x1x1x8xf32>
    %16 = vector.shape_cast %15 : vector<1x1x1x8xf32> to vector<1x1x8xf32>
    %cst_21 = arith.constant 5.000000e-01 : f32
    %17 = vector.broadcast %cst_21 : f32 to vector<1x1x8xf32>
    %18 = arith.cmpf ogt, %16, %17 : vector<1x1x8xf32>
    %cst_22 = arith.constant 0xFF800000 : f32
    %19 = vector.shape_cast %18 : vector<1x1x8xi1> to vector<1x1x8xi1>
    %20 = vector.broadcast %19 : vector<1x1x8xi1> to vector<8x8x8xi1>
    %21 = vector.broadcast %cst_22 : f32 to vector<8x8x8xf32>
    %22 = arith.select %20, %14, %21 : vector<8x8x8xi1>, vector<8x8x8xf32>
    %cst_23 = arith.constant dense<0xFF800000> : vector<8x8xf32>
    %23 = vector.multi_reduction <maximumf>, %22, %cst_23 [2] : vector<8x8x8xf32> to vector<8x8xf32>
    %24 = vector.shape_cast %23 : vector<8x8xf32> to vector<8x8x1xf32>
    %cst_24 = arith.constant -1.000000e+30 : f32
    %25 = vector.broadcast %cst_24 : f32 to vector<8x8x1xf32>
    %26 = arith.maximumf %24, %25 : vector<8x8x1xf32>
    %27 = vector.broadcast %26 : vector<8x8x1xf32> to vector<8x8x8xf32>
    %28 = arith.subf %22, %27 : vector<8x8x8xf32>
    %29 = math.exp %28 : vector<8x8x8xf32>
    %cst_25 = arith.constant dense<0.000000e+00> : vector<8x8xf32>
    %30 = vector.multi_reduction <add>, %29, %cst_25 [2] : vector<8x8x8xf32> to vector<8x8xf32>
    %31 = vector.shape_cast %30 : vector<8x8xf32> to vector<8x8x1xf32>
    %cst_26 = arith.constant 1.000000e-30 : f32
    %32 = vector.broadcast %cst_26 : f32 to vector<8x8x1xf32>
    %33 = arith.maximumf %31, %32 : vector<8x8x1xf32>
    %cst_27 = arith.constant 1.000000e+00 : f32
    %34 = vector.broadcast %cst_27 : f32 to vector<8x8x1xf32>
    %35 = arith.divf %34, %33 : vector<8x8x1xf32>
    %36 = vector.broadcast %35 : vector<8x8x1xf32> to vector<8x8x8xf32>
    %37 = arith.mulf %29, %36 : vector<8x8x8xf32>
    %38 = arith.truncf %37 : vector<8x8x8xf32> to vector<8x8x8xbf16>
    %39 = vector.shape_cast %38 : vector<8x8x8xbf16> to vector<64x8xbf16>
    %c0_28 = arith.constant 0 : index
    %c0_29 = arith.constant 0 : index
    %c0_30 = arith.constant 0 : index
    %40 = vector.load %arg3[%c0_28, %c0_29, %c0_30] : memref<1x8x32xbf16, #tpu.memory_space<vmem>>, vector<1x8x32xbf16>
    %41 = vector.shape_cast %40 : vector<1x8x32xbf16> to vector<8x32xbf16>
    %cst_31 = arith.constant dense<0.000000e+00> : vector<64x32xf32>
    %42 = tpu.matmul %39, %41, %cst_31 {dimension_numbers = #tpu.dot_dimension_numbers<[1], [0], [0], [1], [0, 0, 1, 1], [], []>} : vector<64x8xbf16>, vector<8x32xbf16>, vector<64x32xf32> -> vector<64x32xf32>
    %43 = vector.shape_cast %42 : vector<64x32xf32> to vector<8x8x32xf32>
    %c0_32 = arith.constant 0 : index
    %c0_33 = arith.constant 0 : index
    %c0_34 = arith.constant 0 : index
    %44 = vector.load %arg12[%c0_32, %c0_33, %c0_34] : memref<1x8x32xf32, #tpu.memory_space<vmem>>, vector<1x8x32xf32>
    %45 = vector.broadcast %44 : vector<1x8x32xf32> to vector<8x8x32xf32>
    %46 = arith.mulf %43, %45 : vector<8x8x32xf32>
    %cst_35 = arith.constant dense<0.000000e+00> : vector<8x32xf32>
    %47 = vector.multi_reduction <add>, %46, %cst_35 [1] : vector<8x8x32xf32> to vector<8x32xf32>
    %c0_36 = arith.constant 0 : index
    %c0_37 = arith.constant 0 : index
    %c0_38 = arith.constant 0 : index
    %48 = vector.load %arg7[%c0_36, %c0_37, %c0_38] : memref<1x8x1xf32, #tpu.memory_space<vmem>>, vector<1x8x1xf32>
    %49 = vector.shape_cast %48 : vector<1x8x1xf32> to vector<8x1xf32>
    %cst_39 = arith.constant 5.000000e-01 : f32
    %50 = vector.broadcast %cst_39 : f32 to vector<8x1xf32>
    %51 = arith.cmpf olt, %49, %50 : vector<8x1xf32>
    %c0_40 = arith.constant 0 : index
    %c0_41 = arith.constant 0 : index
    %c0_42 = arith.constant 0 : index
    %52 = vector.load %arg4[%c0_40, %c0_41, %c0_42] : memref<1x1x32xf32, #tpu.memory_space<vmem>>, vector<1x1x32xf32>
    %53 = vector.shape_cast %52 : vector<1x1x32xf32> to vector<1x32xf32>
    %54 = vector.shape_cast %51 : vector<8x1xi1> to vector<8x1xi1>
    %55 = vector.broadcast %54 : vector<8x1xi1> to vector<8x32xi1>
    %56 = vector.shape_cast %53 : vector<1x32xf32> to vector<1x32xf32>
    %57 = vector.broadcast %56 : vector<1x32xf32> to vector<8x32xf32>
    %58 = arith.select %55, %57, %47 : vector<8x32xi1>, vector<8x32xf32>
    %c0_43 = arith.constant 0 : index
    %c0_44 = arith.constant 0 : index
    %c0_45 = arith.constant 0 : index
    %59 = vector.load %arg2[%c0_43, %c0_44, %c0_45] : memref<1x8x32xf32, #tpu.memory_space<vmem>>, vector<1x8x32xf32>
    %60 = vector.shape_cast %59 : vector<1x8x32xf32> to vector<8x32xf32>
    %c0_46 = arith.constant 0 : index
    %c0_47 = arith.constant 0 : index
    %61 = vector.load %arg13[%c0_46, %c0_47] : memref<32x32xf32, #tpu.memory_space<vmem>>, vector<32x32xf32>
    %cst_48 = arith.constant dense<0.000000e+00> : vector<8x32xf32>
    %62 = tpu.matmul %58, %61, %cst_48 {dimension_numbers = #tpu.dot_dimension_numbers<[1], [0], [0], [1], [0, 0, 1, 1], [], []>} : vector<8x32xf32>, vector<32x32xf32>, vector<8x32xf32> -> vector<8x32xf32>
    %63 = arith.addf %60, %62 : vector<8x32xf32>
    %c0_49 = arith.constant 0 : index
    %c0_50 = arith.constant 0 : index
    %64 = vector.load %arg14[%c0_49, %c0_50] : memref<1x32xf32, #tpu.memory_space<vmem>>, vector<1x32xf32>
    %65 = vector.broadcast %64 : vector<1x32xf32> to vector<8x32xf32>
    %66 = arith.addf %63, %65 : vector<8x32xf32>
    %cst_51 = arith.constant dense<0.000000e+00> : vector<8xf32>
    %67 = vector.multi_reduction <add>, %66, %cst_51 [1] : vector<8x32xf32> to vector<8xf32>
    %68 = vector.shape_cast %67 : vector<8xf32> to vector<8x1xf32>
    %cst_52 = arith.constant 3.200000e+01 : f32
    %69 = vector.broadcast %cst_52 : f32 to vector<8x1xf32>
    %70 = arith.divf %68, %69 : vector<8x1xf32>
    %71 = vector.broadcast %70 : vector<8x1xf32> to vector<8x32xf32>
    %72 = arith.subf %66, %71 : vector<8x32xf32>
    %73 = arith.mulf %72, %72 : vector<8x32xf32>
    %cst_53 = arith.constant dense<0.000000e+00> : vector<8xf32>
    %74 = vector.multi_reduction <add>, %73, %cst_53 [1] : vector<8x32xf32> to vector<8xf32>
    %75 = vector.shape_cast %74 : vector<8xf32> to vector<8x1xf32>
    %cst_54 = arith.constant 3.200000e+01 : f32
    %76 = vector.broadcast %cst_54 : f32 to vector<8x1xf32>
    %77 = arith.divf %75, %76 : vector<8x1xf32>
    %78 = vector.broadcast %70 : vector<8x1xf32> to vector<8x32xf32>
    %79 = arith.subf %66, %78 : vector<8x32xf32>
    %cst_55 = arith.constant 9.99999974E-6 : f32
    %80 = vector.broadcast %cst_55 : f32 to vector<8x1xf32>
    %81 = arith.addf %77, %80 : vector<8x1xf32>
    %82 = math.rsqrt %81 : vector<8x1xf32>
    %83 = vector.broadcast %82 : vector<8x1xf32> to vector<8x32xf32>
    %84 = arith.mulf %79, %83 : vector<8x32xf32>
    %c0_56 = arith.constant 0 : index
    %c0_57 = arith.constant 0 : index
    %85 = vector.load %arg15[%c0_56, %c0_57] : memref<1x32xf32, #tpu.memory_space<vmem>>, vector<1x32xf32>
    %86 = vector.broadcast %85 : vector<1x32xf32> to vector<8x32xf32>
    %87 = arith.mulf %84, %86 : vector<8x32xf32>
    %c0_58 = arith.constant 0 : index
    %c0_59 = arith.constant 0 : index
    %88 = vector.load %arg16[%c0_58, %c0_59] : memref<1x32xf32, #tpu.memory_space<vmem>>, vector<1x32xf32>
    %89 = vector.broadcast %88 : vector<1x32xf32> to vector<8x32xf32>
    %90 = arith.addf %87, %89 : vector<8x32xf32>
    %c0_60 = arith.constant 0 : index
    %c0_61 = arith.constant 0 : index
    %c0_62 = arith.constant 0 : index
    %91 = vector.load %arg17[%c0_60, %c0_61, %c0_62] : memref<1x8x32xf32, #tpu.memory_space<vmem>>, vector<1x8x32xf32>
    %92 = vector.shape_cast %91 : vector<1x8x32xf32> to vector<8x32xf32>
    %93 = vector.shape_cast %90 : vector<8x32xf32> to vector<1x8x32xf32>
    tpu.vector_store %arg17[%c0_60, %c0_61, %c0_62], %93 {strides = array<i32>} : memref<1x8x32xf32, #tpu.memory_space<vmem>>, vector<1x8x32xf32>,
    return
  }
  func.func @transform_0(%arg0: i32, %arg1: i32) -> (i32, i32, i32) {
    %c0_i32 = arith.constant 0 : i32
    %c0_i32_0 = arith.constant 0 : i32
    return %arg0, %arg1, %c0_i32 : i32, i32, i32
  }
  func.func @transform_1(%arg0: i32, %arg1: i32) -> (i32, i32, i32) {
    %c0_i32 = arith.constant 0 : i32
    %c0_i32_0 = arith.constant 0 : i32
    %c0_i32_1 = arith.constant 0 : i32
    return %arg0, %c0_i32, %c0_i32_0 : i32, i32, i32
  }
  func.func @transform_2(%arg0: i32, %arg1: i32) -> (i32, i32, i32) {
    %c0_i32 = arith.constant 0 : i32
    %c0_i32_0 = arith.constant 0 : i32
    %c0_i32_1 = arith.constant 0 : i32
    return %arg0, %c0_i32, %c0_i32_0 : i32, i32, i32
  }
  func.func @transform_3(%arg0: i32, %arg1: i32) -> (i32, i32, i32, i32) {
    %c0_i32 = arith.constant 0 : i32
    %c0_i32_0 = arith.constant 0 : i32
    %c0_i32_1 = arith.constant 0 : i32
    return %arg0, %arg1, %c0_i32, %c0_i32_0 : i32, i32, i32, i32
  }
  func.func @transform_4(%arg0: i32, %arg1: i32) -> (i32, i32, i32, i32) {
    %c0_i32 = arith.constant 0 : i32
    %c0_i32_0 = arith.constant 0 : i32
    %c0_i32_1 = arith.constant 0 : i32
    %c0_i32_2 = arith.constant 0 : i32
    return %arg0, %c0_i32, %c0_i32_0, %c0_i32_1 : i32, i32, i32, i32
  }
  func.func @transform_5(%arg0: i32, %arg1: i32) -> (i32, i32, i32) {
    %c0_i32 = arith.constant 0 : i32
    %c0_i32_0 = arith.constant 0 : i32
    return %arg0, %arg1, %c0_i32 : i32, i32, i32
  }
  func.func @transform_6(%arg0: i32, %arg1: i32) -> (i32, i32, i32) {
    %c0_i32 = arith.constant 0 : i32
    %c0_i32_0 = arith.constant 0 : i32
    %c0_i32_1 = arith.constant 0 : i32
    %c0_i32_2 = arith.constant 0 : i32
    return %c0_i32, %c0_i32_0, %c0_i32_1 : i32, i32, i32
  }
  func.func @transform_7(%arg0: i32, %arg1: i32) -> (i32, i32, i32) {
    %c0_i32 = arith.constant 0 : i32
    %c0_i32_0 = arith.constant 0 : i32
    %c0_i32_1 = arith.constant 0 : i32
    %c0_i32_2 = arith.constant 0 : i32
    return %c0_i32, %c0_i32_0, %c0_i32_1 : i32, i32, i32
  }
  func.func @transform_8(%arg0: i32, %arg1: i32) -> (i32, i32, i32) {
    %c0_i32 = arith.constant 0 : i32
    %c0_i32_0 = arith.constant 0 : i32
    %c0_i32_1 = arith.constant 0 : i32
    %c0_i32_2 = arith.constant 0 : i32
    return %c0_i32, %c0_i32_0, %c0_i32_1 : i32, i32, i32
  }
  func.func @transform_9(%arg0: i32, %arg1: i32) -> (i32, i32, i32) {
    %c0_i32 = arith.constant 0 : i32
    %c0_i32_0 = arith.constant 0 : i32
    %c0_i32_1 = arith.constant 0 : i32
    %c0_i32_2 = arith.constant 0 : i32
    return %c0_i32, %c0_i32_0, %c0_i32_1 : i32, i32, i32
  }
  func.func @transform_10(%arg0: i32, %arg1: i32) -> (i32, i32, i32) {
    %c0_i32 = arith.constant 0 : i32
    %c0_i32_0 = arith.constant 0 : i32
    %c0_i32_1 = arith.constant 0 : i32
    %c0_i32_2 = arith.constant 0 : i32
    return %c0_i32, %c0_i32_0, %c0_i32_1 : i32, i32, i32
  }
  func.func @transform_11(%arg0: i32, %arg1: i32) -> (i32, i32) {
    %c0_i32 = arith.constant 0 : i32
    %c0_i32_0 = arith.constant 0 : i32
    %c0_i32_1 = arith.constant 0 : i32
    return %c0_i32, %c0_i32_0 : i32, i32
  }
  func.func @transform_12(%arg0: i32, %arg1: i32) -> (i32, i32) {
    %c0_i32 = arith.constant 0 : i32
    %c0_i32_0 = arith.constant 0 : i32
    %c0_i32_1 = arith.constant 0 : i32
    return %c0_i32, %c0_i32_0 : i32, i32
  }
  func.func @transform_13(%arg0: i32, %arg1: i32) -> (i32, i32) {
    %c0_i32 = arith.constant 0 : i32
    %c0_i32_0 = arith.constant 0 : i32
    %c0_i32_1 = arith.constant 0 : i32
    return %c0_i32, %c0_i32_0 : i32, i32
  }
  func.func @transform_14(%arg0: i32, %arg1: i32) -> (i32, i32) {
    %c0_i32 = arith.constant 0 : i32
    %c0_i32_0 = arith.constant 0 : i32
    %c0_i32_1 = arith.constant 0 : i32
    return %c0_i32, %c0_i32_0 : i32, i32
  }
  func.func @transform_15(%arg0: i32, %arg1: i32) -> (i32, i32, i32) {
    %c0_i32 = arith.constant 0 : i32
    %c0_i32_0 = arith.constant 0 : i32
    return %arg0, %arg1, %c0_i32 : i32, i32, i32
  }
}

</mosaic_0001>

<bundles_post_ra>
// kernel: tpu_custom_call.1
= control target key start
LH: loop header
LB: loop body
LE: loop exit
PB: predicated region body
PF: predicated region fallthrough
CT: control target
= control target key end

     0   :  { %s3630_s0 = inlined_call_operand.vmem [shape: f32[2,8,32], index: 0, kind: input, shape index: {}]   ;;  %s3631_s1 = inlined_call_operand.vmem [shape: bf16[2,8,32], index: 1, kind: input, shape index: {}]   ;;  %s3632_s2 = inlined_call_operand.vmem [shape: f32[2,1,32], index: 2, kind: input, shape index: {}]   ;;  %s3633_s3 = inlined_call_operand.vmem [shape: bf16[2,8,53,8], index: 3, kind: input, shape index: {}]   ;;  %s3634_s4 = inlined_call_operand.vmem [shape: f32[2,1,1,8], index: 4, kind: input, shape index: {}]   ;;  %s3635_s5 = inlined_call_operand.vmem [shape: f32[2,8,1], index: 5, kind: input, shape index: {}]   ;;  %s3636_s6 = inlined_call_operand.vmem [shape: bf16[8,32,53], index: 6, kind: input, shape index: {}]   ;;  %s3637_s7 = inlined_call_operand.vmem [shape: f32[1,32,1], index: 7, kind: input, shape index: {}]   ;;  %s3638_s8 = inlined_call_operand.vmem [shape: bf16[8,8,32], index: 8, kind: input, shape index: {}]   ;;  %s3639_s9 = inlined_call_operand.vmem [shape: f32[1,8,1], index: 9, kind: input, shape index: {}]   ;;  %s3640_s10 = inlined_call_operand.vmem [shape: f32[1,8,32], index: 10, kind: input, shape index: {}]   ;;  %s3641_s11 = inlined_call_operand.vmem [shape: f32[32,32], index: 11, kind: input, shape index: {}]   ;;  %s3642_s12 = inlined_call_operand.vmem [shape: f32[1,32], index: 12, kind: input, shape index: {}]   ;;  %s3643_s13 = inlined_call_operand.vmem [shape: f32[1,32], index: 13, kind: input, shape index: {}]   ;;  %s3644_s14 = inlined_call_operand.vmem [shape: f32[1,32], index: 14, kind: input, shape index: {}]   ;;  %s3645_s15 = inlined_call_operand.hbm [shape: f32[2,8,32], index: 15, kind: output, shape index: {}]  }
   0x1   :  { %3649 = sst [smem:[#allocation7_spill]] %s3630_s0 }
   0x2   :  { %3650 = sst [smem:[#allocation8_spill]] %s3631_s1 }
   0x3   :  { %3651 = sst [smem:[#allocation9_spill]] %s3632_s2 }
   0x4   :  { %3652 = sst [smem:[#allocation10_spill]] %s3633_s3 }
   0x5   :  { %3653 = sst [smem:[#allocation11_spill]] %s3634_s4 }
   0x6   :  { %20 = vsyncpa [#allocation3], 0 }
   0x7   :  { %22 = vsyncpa [#allocation3 + $0x1], 0  ;;  %s3160_s18 = smov 0   ;;  %s3162_s19 = smov 0  }
   0x8   :  { %s3164_s20 = smov 0   ;;  %s3166_s21 = smov 0  }
   0x9   :  { %s3168_s22 = smov 0   ;;  %s3170_s23 = smov 0  }
   0xa LB: > { %3654 = sst [smem:[#allocation5_spill]] %s3068_s22  ;;  %s2476_s24 = sadd.s32 4294967295, %s3072_s23   ;;  %s3072_s23 = sphi %s3170_s23, %s28_s23   ;;  %s3068_s22 = sphi %s3168_s22, %s3665_s22   ;;  %s3064_s21 = sphi %s3166_s21, %s3664_s21   ;;  %s3060_s20 = sphi %s3164_s20, %s3668_s20   ;;  %s3056_s19 = sphi %s3162_s19, %s3667_s19   ;;  %s3052_s18 = sphi %s3160_s18, %s3666_s18  }
   0xb   : > { %s2477_s25 = sadd.s32 4294967294, %s3072_s23   ;;  %s40_s26 = sadd.s32 1, %s3068_s22 }
   0xc   : > { %s400_s27 = sadd.s32 1, %s3060_s20  ;;  %p42_p0 = scmp.ge.s32.totalorder %s40_s26, 2 }
   0xd   : > { %p410_p1 = scmp.ne.s32.totalorder %s3060_s20, %s3056_s19  ;;  %p411_p2 = scmp.eq.s32.totalorder %s2476_s24, 1 }
   0xe   : > { %p416_p3 = scmp.ne.s32.totalorder %s3056_s19, %s3052_s18  ;;  %s3670_s26 = smov (%p42_p0, %s40_s26), 0 }
   0xf   : > { %3655 = sst [smem:[#allocation6_spill]] %s3670_s26  ;;  %p3200_p4 = por %p411_p2, %p410_p1 }
  0x10   : > { %p417_p5 = scmp.eq.s32.totalorder %s2477_s25, 1  ;;  %s395_s29 = ssub.s32 %s3068_s22, %s3670_s26 }
  0x11   : > { %p2480_p6 = scmp.ge.s32.totalorder %s3072_s23, 1  ;;  %p398_p7 = scmp.eq.s32.totalorder %s395_s29, 0 }
  0x12   : > { %p3207_p8 = por %p417_p5, %p416_p3  ;;  %p515_p9 = scmp.lt.s32.totalorder %s3072_s23, 3 }
  0x13   : > { %s3213_s16 = scalar_select %p398_p7, %s3060_s20, %s400_s27  }
  0x14   : > { %p516_p10 = pnand %p2480_p6, %p515_p9 }
  0x15   : > { %p592_p11 = scmp.lt.s32.totalorder (!%p516_p10), %s3064_s21, 1  ;;  %v2920_v0 = vld [vmem:[%s3636_s6] sm:$0xff] (!%p516_p10)   ;;  %vm771_vm0 = vcmask (!%p516_p10), 433152   ;;  %v2921_v1 = vld [vmem:[%s3636_s6 + $0x10] sm:$0xff] (!%p516_p10)   ;;  %v3074_v2 = vmov (!%p516_p10), 0   ;;  %s3658_s3 = sld [smem:[#allocation10_spill]] (!%p516_p10) }
  0x16   : > { %519 = sbr.rel (%p516_p10) target bundleno = 1640 (0x668), region = 80  ;;  %2669 = vmatprep.mubr.msk.bf16.mxu0 (!%p516_p10), %vm771_vm0, %v2920_v0  ;;  %2681 = vmatprep.mubr.msk.bf16.mxu1 (!%p516_p10), %vm771_vm0, %v2921_v1  ;;  %vm778_vm1 = vcmask (!%p516_p10), 1041408   ;;  %vm779_vm2 = vcmask (!%p516_p10), 1042432   ;;  %v3075_v6 = vmov (!%p516_p10), 65535   ;;  %v2922_v18 = vld [vmem:[%s3636_s6 + $0x8] sm:$0xff] (!%p516_p10)   ;;  %v2923_v19 = vld [vmem:[%s3636_s6 + $0x18] sm:$0xff] (!%p516_p10)  }
  0x17   : > { %2911 = vset.pattern.permute.xlu1 (!%p516_p10), %v3074_v2  ;;  %2910 = vset.pattern.permute.xlu0 (!%p516_p10), %v3074_v2  ;;  %v780_v7 = vsel (!%p516_p10), %vm778_vm1, 4294967295, %v3075_v6  ;;  %v2932_v20 = vld [vmem:[%s3636_s6 + $0x20] sm:$0xff] (!%p516_p10)   ;;  %v2933_v24 = vld [vmem:[%s3636_s6 + $0x30] sm:$0xff] (!%p516_p10)   ;;  %v2934_v30 = vld [vmem:[%s3636_s6 + $0x28] sm:$0xff] (!%p516_p10)   ;;  %v3076_v1 = vmov (!%p516_p10), 0.0   ;;  %vm3077_vm3 = vmmov (!%p516_p10), 0  }
  0x18   : > { %v3241_v11 = vsel (!%p516_p10), %vm779_vm2, %v780_v7, 0  ;;  %v2935_v33 = vld [vmem:[%s3636_s6 + $0x38] sm:$0xff] (!%p516_p10)   ;;  %v2944_v36 = vld [vmem:[%s3636_s6 + $0x40] sm:$0xff] (!%p516_p10)   ;;  %v2945_v39 = vld [vmem:[%s3636_s6 + $0x50] sm:$0xff] (!%p516_p10)   ;;  %vm1519_vm4 = vcmask (!%p516_p10), 261120   ;;  %s3659_s4 = sld [smem:[#allocation11_spill]] (!%p516_p10) }
  0x19   : > { %v718_v42 = vld [vmem:[%s3637_s7 + $0x10] sm:$0xff] (!%p516_p10)  ;;  %v716_v44 = vld [vmem:[%s3637_s7] sm:$0xff] (!%p516_p10)  ;;  %v719_v46 = vld [vmem:[%s3637_s7 + $0x18] sm:$0xff] (!%p516_p10)  ;;  %vm1880_vm7 = vcmask (!%p516_p10), 64512   ;;  %s3660_s1 = sld [smem:[#allocation8_spill]] (!%p516_p10)  ;;  %vm2034_vm8 = vcmask (!%p516_p10), 1043456  }
  0x1a   : > { %732 = vperm.xlu1 (!%p516_p10), %2911, %v718_v42   ;;  %722 = vperm.xlu0 (!%p516_p10), %2910, %v716_v44   ;;  %v717_v47 = vld [vmem:[%s3637_s7 + $0x8] sm:$0xff] (!%p516_p10)  ;;  %v2947_v51 = vld [vmem:[%s3636_s6 + $0x58] sm:$0xff] (!%p516_p10)   ;;  %v1513_v52 = vld [vmem:[%s3639_s9] sm:$0xff] (!%p516_p10)  ;;  %vm2190_vm10 = vcmask (!%p516_p10), 1041409   ;;  %vm2192_vm11 = vcmask (!%p516_p10), 1042434   ;;  %vm2194_vm12 = vcmask (!%p516_p10), 1043459  }
  0x1b   : > { %v2946_v50 = vld [vmem:[%s3636_s6 + $0x48] sm:$0xff] (!%p516_p10)   ;;  %v2956_v55 = vld [vmem:[%s3636_s6 + $0x60] sm:$0xff] (!%p516_p10)   ;;  %v2957_v56 = vld [vmem:[%s3636_s6 + $0x70] sm:$0xff] (!%p516_p10)   ;;  %vm2196_vm13 = vcmask (!%p516_p10), 1044484   ;;  %vm2198_vm14 = vcmask (!%p516_p10), 1045509   ;;  %s3661_s2 = sld [smem:[#allocation9_spill]] (!%p516_p10) }
  0x1c   : > { %v2958_v63 = vld [vmem:[%s3636_s6 + $0x68] sm:$0xff] (!%p516_p10)   ;;  %v2959_v0 = vld [vmem:[%s3636_s6 + $0x78] sm:$0xff] (!%p516_p10)   ;;  %vm2200_vm15 = vcmask (!%p516_p10), 1046534   ;;  %s3663_s0 = sld [smem:[#allocation7_spill]] (!%p516_p10) }
  0x1d   : > { %s3223_s29 = scalar_select %p592_p11, %s3064_s21, 1 }
  0x1e   : > { %737 = vperm.xlu1 %2911, %v719_v46   ;;  %727 = vperm.xlu0 %2910, %v717_v47  }
  0x1f   : > { %s2849_s27 = smul.u32 224, %s3223_s29  ;;  %s619_s24 = scalar_lea.vmem %s3659_s4, %s3223_s29 }
  0x20   : > { %s3662_s17 = sshll.u32 %s3223_s29, 3 }
  0x21   : > { %s3233_s22 = scalar_lea.vmem %s3658_s3, %s2849_s27  ;;  %s3648_s27 = sshll.u32 %s3223_s29, 3 }
  0x22   : > { %v2912_v3 = vld [vmem:[%s3233_s22] sm:$0xff]   ;;  %v2914_v5 = vld [vmem:[%s3233_s22 + $0x8] sm:$0xff]   ;;  %v2916_v9 = vld [vmem:[%s3233_s22 + $0x10] sm:$0xff]   ;;  %1516 = vperm.xlu0 %2910, %v1513_v52   ;;  %s626_s26 = scalar_lea.vmem %s3635_s5, %s3648_s27 }
  0x23   : > { %v2913_v4 = vld [vmem:[%s3233_s22 + $0x1c] sm:$0xff]   ;;  %2661 = vmatprep.subr.bf16.mxu0 %v2912_v3  ;;  %v2915_v8 = vld [vmem:[%s3233_s22 + $0x24] sm:$0xff]   ;;  %v2917_v10 = vld [vmem:[%s3233_s22 + $0x2c] sm:$0xff]  }
  0x24   : > { %2673 = vmatprep.subr.bf16.mxu1 %v2913_v4  ;;  %2662 = vmatpush3.bf16.msra.mxu0 %v2912_v3  ;;  %v2918_v12 = vld [vmem:[%s3233_s22 + $0x18] ss:$0 sps:$4 sm:$0x77]   ;;  %v2919_v13 = vld [vmem:[%s3233_s22 + $0x34] ss:$0 sps:$4 sm:$0x77]  }
  0x25   : > { %2674 = vmatpush3.bf16.msra.mxu1 %v2913_v4  ;;  %2663 = vmatprep.subr.bf16.mxu0 %v2914_v5  ;;  %v783_v14 = vand.u32 %v2918_v12, %v3241_v11  ;;  %v872_v15 = vand.u32 %v2919_v13, %v3241_v11  ;;  %v2924_v16 = vld [vmem:[%s3233_s22 + $0x38] sm:$0xff]   ;;  %v2926_v21 = vld [vmem:[%s3233_s22 + $0x40] sm:$0xff]   ;;  %v2930_v23 = vld [vmem:[%s3233_s22 + $0x50] ss:$0 sps:$4 sm:$0x77]  }
  0x26   : > { %2675 = vmatprep.subr.bf16.mxu1 %v2915_v8  ;;  %v2925_v17 = vld [vmem:[%s3233_s22 + $0x54] sm:$0xff]   ;;  %v2927_v22 = vld [vmem:[%s3233_s22 + $0x5c] sm:$0xff]   ;;  %v2931_v25 = vld [vmem:[%s3233_s22 + $0x6c] ss:$0 sps:$4 sm:$0x77]   ;;  %v961_v28 = vand.u32 %v2930_v23, %v3241_v11 }
  0x27   : > { %v2928_v26 = vld [vmem:[%s3233_s22 + $0x48] sm:$0xff]   ;;  %v1050_v29 = vand.u32 %v2931_v25, %v3241_v11  ;;  %v2936_v31 = vld [vmem:[%s3233_s22 + $0x70] sm:$0xff]   ;;  %v2938_v34 = vld [vmem:[%s3233_s22 + $0x78] sm:$0xff]  }
  0x28   : > { %2664 = vmatpush3.bf16.msra.mxu0 %v2914_v5  ;;  %v2929_v27 = vld [vmem:[%s3233_s22 + $0x64] sm:$0xff]   ;;  %v2937_v32 = vld [vmem:[%s3233_s22 + $0x8c] sm:$0xff]   ;;  %v2939_v35 = vld [vmem:[%s3233_s22 + $0x94] sm:$0xff]  }
  0x29   : > { %2676 = vmatpush3.bf16.msra.mxu1 %v2915_v8  ;;  %2665 = vmatprep.subr.bf16.mxu0 %v2916_v9  ;;  %v2940_v37 = vld [vmem:[%s3233_s22 + $0x80] sm:$0xff]   ;;  %v2942_v38 = vld [vmem:[%s3233_s22 + $0x88] ss:$0 sps:$4 sm:$0x77]   ;;  %v2950_v53 = vld [vmem:[%s3233_s22 + $0xb0] sm:$0xff]  }
  0x2a   : > { %2677 = vmatprep.subr.bf16.mxu1 %v2917_v10  ;;  %v2941_v40 = vld [vmem:[%s3233_s22 + $0x9c] sm:$0xff]   ;;  %v2943_v41 = vld [vmem:[%s3233_s22 + $0xa4] ss:$0 sps:$4 sm:$0x77]   ;;  %v1139_v43 = vand.u32 %v2942_v38, %v3241_v11  ;;  %v2948_v48 = vld [vmem:[%s3233_s22 + $0xa8] sm:$0xff]  }
  0x2b   : > { %v1228_v45 = vand.u32 %v2943_v41, %v3241_v11  ;;  %v2949_v49 = vld [vmem:[%s3233_s22 + $0xc4] sm:$0xff]   ;;  %v2951_v54 = vld [vmem:[%s3233_s22 + $0xcc] sm:$0xff]   ;;  %v2952_v57 = vld [vmem:[%s3233_s22 + $0xb8] sm:$0xff]  }
  0x2c   : > { %2666 = vmatpush3.bf16.msra.mxu0 %v2916_v9  ;;  %v2954_v58 = vld [vmem:[%s3233_s22 + $0xc0] ss:$0 sps:$4 sm:$0x77]   ;;  %v2953_v59 = vld [vmem:[%s3233_s22 + $0xd4] sm:$0xff]  }
  0x2d   : > { %2678 = vmatpush3.bf16.msra.mxu1 %v2917_v10  ;;  %2667 = vmatprep.subr.bf16.mxu0 %v783_v14  ;;  %v2955_v60 = vld [vmem:[%s3233_s22 + $0xdc] ss:$0 sps:$4 sm:$0x77]   ;;  %v1317_v61 = vand.u32 %v2954_v58, %v3241_v11  ;;  %v1506_v58 = vld [vmem:[%s3638_s8 + $0x4] sm:$0xf]  ;;  %s2483_s22 = sshll.u32 %s3223_s29, 2 }
  0x2e   : > { %2679 = vmatprep.subr.bf16.mxu1 %v872_v15  ;;  %v1406_v62 = vand.u32 %v2955_v60, %v3241_v11  ;;  %s602_s3 = scalar_lea.vmem %s3660_s1, %s2483_s22  ;;  %s598_s22 = scalar_lea.vmem %s3663_s0, %s3662_s17 }
  0x30   : > { %2668 = vmatpush3.bf16.msra.mxu0 %v783_v14 }
  0x31   : > { %2680 = vmatpush3.bf16.msra.mxu1 %v872_v15  ;;  %2685 = vmatprep.subr.bf16.mxu0 %v2924_v16 }
  0x32   : > { %2697 = vmatprep.subr.bf16.mxu1 %v2925_v17 }
  0x33   : > { %2670 = vmatmul.mubr.msk.bf16.vlgmr.msra.gmra.mrb[0].mxu0 %vm771_vm0, %v2922_v18 }
  0x34   : > { %2682 = vmatmul.mubr.msk.bf16.vlgmr.msra.gmra.mrb[0].mxu1 %vm771_vm0, %v2923_v19  ;;  %2686 = vmatpush3.bf16.msra.mxu0 %v2924_v16 }
  0x35   : > { %2698 = vmatpush3.bf16.msra.mxu1 %v2925_v17  ;;  %2687 = vmatprep.subr.bf16.mxu0 %v2926_v21 }
  0x36   : > { %2699 = vmatprep.subr.bf16.mxu1 %v2927_v22  ;;  %2693 = vmatprep.mubr.msk.bf16.mxu0 %vm771_vm0, %v2932_v20 }
  0x37   : > { %2705 = vmatprep.mubr.msk.bf16.mxu1 %vm771_vm0, %v2933_v24 }
  0x38   : > { %2688 = vmatpush3.bf16.msra.mxu0 %v2926_v21 }
  0x39   : > { %2700 = vmatpush3.bf16.msra.mxu1 %v2927_v22  ;;  %2689 = vmatprep.subr.bf16.mxu0 %v2928_v26 }
  0x3a   : > { %2701 = vmatprep.subr.bf16.mxu1 %v2929_v27 }
  0x3c   : > { %2690 = vmatpush3.bf16.msra.mxu0 %v2928_v26 }
  0x3d   : > { %2702 = vmatpush3.bf16.msra.mxu1 %v2929_v27  ;;  %2691 = vmatprep.subr.bf16.mxu0 %v961_v28 }
  0x3e   : > { %2703 = vmatprep.subr.bf16.mxu1 %v1050_v29 }
  0x40   : > { %2692 = vmatpush3.bf16.msra.mxu0 %v961_v28 }
  0x41   : > { %2704 = vmatpush3.bf16.msra.mxu1 %v1050_v29  ;;  %2709 = vmatprep.subr.bf16.mxu0 %v2936_v31 }
  0x42   : > { %2721 = vmatprep.subr.bf16.mxu1 %v2937_v32 }
  0x43   : > { %2694 = vmatmul.mubr.msk.bf16.vlgmr.msra.gmra.mrb[4].mxu0 %vm771_vm0, %v2934_v30 }
  0x44   : > { %2706 = vmatmul.mubr.msk.bf16.vlgmr.msra.gmra.mrb[4].mxu1 %vm771_vm0, %v2935_v33  ;;  %2710 = vmatpush3.bf16.msra.mxu0 %v2936_v31 }
  0x45   : > { %2722 = vmatpush3.bf16.msra.mxu1 %v2937_v32  ;;  %2711 = vmatprep.subr.bf16.mxu0 %v2938_v34 }
  0x46   : > { %2723 = vmatprep.subr.bf16.mxu1 %v2939_v35  ;;  %2717 = vmatprep.mubr.msk.bf16.mxu0 %vm771_vm0, %v2944_v36 }
  0x47   : > { %2729 = vmatprep.mubr.msk.bf16.mxu1 %vm771_vm0, %v2945_v39 }
  0x48   : > { %2712 = vmatpush3.bf16.msra.mxu0 %v2938_v34 }
  0x49   : > { %2724 = vmatpush3.bf16.msra.mxu1 %v2939_v35  ;;  %2713 = vmatprep.subr.bf16.mxu0 %v2940_v37  ;;  %v1505_v35 = vld [vmem:[%s3638_s8] sm:$0xf] }
  0x4a   : > { %2725 = vmatprep.subr.bf16.mxu1 %v2941_v40 }
  0x4c   : > { %2714 = vmatpush3.bf16.msra.mxu0 %v2940_v37 }
  0x4d   : > { %2726 = vmatpush3.bf16.msra.mxu1 %v2941_v40  ;;  %2715 = vmatprep.subr.bf16.mxu0 %v1139_v43 }
  0x4e   : > { %2727 = vmatprep.subr.bf16.mxu1 %v1228_v45 }
  0x50   : > { %2716 = vmatpush3.bf16.msra.mxu0 %v1139_v43 }
  0x51   : > { %2728 = vmatpush3.bf16.msra.mxu1 %v1228_v45  ;;  %2733 = vmatprep.subr.bf16.mxu0 %v2948_v48 }
  0x52   : > { %2745 = vmatprep.subr.bf16.mxu1 %v2949_v49 }
  0x53   : > { %2718 = vmatmul.mubr.msk.bf16.vlgmr.msra.gmra.mrb[8].mxu0 %vm771_vm0, %v2946_v50 }
  0x54   : > { %2730 = vmatmul.mubr.msk.bf16.vlgmr.msra.gmra.mrb[8].mxu1 %vm771_vm0, %v2947_v51  ;;  %2734 = vmatpush3.bf16.msra.mxu0 %v2948_v48 }
  0x55   : > { %2746 = vmatpush3.bf16.msra.mxu1 %v2949_v49  ;;  %2735 = vmatprep.subr.bf16.mxu0 %v2950_v53 }
  0x56   : > { %2747 = vmatprep.subr.bf16.mxu1 %v2951_v54  ;;  %2741 = vmatprep.mubr.msk.bf16.mxu0 %vm771_vm0, %v2956_v55 }
  0x57   : > { %2753 = vmatprep.mubr.msk.bf16.mxu1 %vm771_vm0, %v2957_v56 }
  0x58   : > { %2736 = vmatpush3.bf16.msra.mxu0 %v2950_v53 }
  0x59   : > { %2748 = vmatpush3.bf16.msra.mxu1 %v2951_v54  ;;  %2737 = vmatprep.subr.bf16.mxu0 %v2952_v57 }
  0x5a   : > { %2749 = vmatprep.subr.bf16.mxu1 %v2953_v59 }
  0x5c   : > { %2738 = vmatpush3.bf16.msra.mxu0 %v2952_v57 }
  0x5d   : > { %2750 = vmatpush3.bf16.msra.mxu1 %v2953_v59  ;;  %2739 = vmatprep.subr.bf16.mxu0 %v1317_v61 }
  0x5e   : > { %2751 = vmatprep.subr.bf16.mxu1 %v1406_v62 }
  0x60   : > { %2740 = vmatpush3.bf16.msra.mxu0 %v1317_v61 }
  0x61   : > { %2752 = vmatpush3.bf16.msra.mxu1 %v1406_v62  ;;  %2773 = vmatprep.subr.bf16.mxu0 %v3076_v1 }
  0x62   : > { %2757 = vmatprep.subr.bf16.mxu1 %v3076_v1 }
  0x63   : > { %2742 = vmatmul.mubr.msk.bf16.vlgmr.msra.gmra.mrb[12].mxu0 %vm771_vm0, %v2958_v63 }
  0x64   : > { %2754 = vmatmul.mubr.msk.bf16.vlgmr.msra.gmra.mrb[12].mxu1 %vm771_vm0, %v2959_v0  ;;  %2777 = vmatprep.mubr.msk.bf16.mxu0 %vm3077_vm3, %v3076_v1  ;;  %vm2202_vm0 = vcmask 1047559  }
  0x65   : > { %2761 = vmatprep.mubr.msk.bf16.mxu1 %vm3077_vm3, %v3076_v1 }
  0x99   : > { %v3354_v3 = vpop.permute.xlu1 %732  ;;  %v3356_v4 = vpop.permute.xlu0 %722 }
  0x9d   : > { %v3358_v5 = vpop.permute.xlu1 %737  ;;  %v3360_v7 = vpop.permute.xlu0 %727 }
 0x106   : > { %v2671_v6 = vpop.f32.mrb[0].mxu0 }
 0x107   : > { %v828_v8 = vadd.f32 %v2671_v6, %v3354_v3  ;;  %v2683_v9 = vpop.f32.mrb[0].mxu1  ;;  %v819_v10 = vpop.f32.mrb[1].mxu0  ;;  %v1507_v6 = vld [vmem:[%s3638_s8 + $0x8] sm:$0xf] }
 0x108   : > { %v917_v11 = vadd.f32 %v2683_v9, %v3354_v3  ;;  %v820_v12 = vadd.f32 %v819_v10, %v3356_v4  ;;  %v908_v13 = vpop.f32.mrb[1].mxu1  ;;  %v2672_v14 = vpop.f32.mrb[2].mxu0 }
 0x109   : > { %v1459_v15 = vmax.f32 %v828_v8, 0.0  ;;  %v909_v16 = vadd.f32 %v908_v13, %v3356_v4  ;;  %v831_v17 = vadd.f32 %v2672_v14, %v3358_v5  ;;  %v2684_v18 = vpop.f32.mrb[2].mxu1  ;;  %v822_v19 = vpop.f32.mrb[3].mxu0  ;;  %v1508_v8 = vld [vmem:[%s3638_s8 + $0xc] sm:$0xf] }
 0x10a   : > { %v1463_v20 = vmax.f32 %v917_v11, 0.0  ;;  %v920_v21 = vadd.f32 %v2684_v18, %v3358_v5  ;;  %v823_v22 = vadd.f32 %v822_v19, %v3360_v7  ;;  %v911_v23 = vpop.f32.mrb[3].mxu1  ;;  %v1457_v26 = vmax.f32 %v820_v12, 0.0 }
 0x10b   : > { %v1460_v24 = vmax.f32 %v831_v17, 0.0  ;;  %v912_v25 = vadd.f32 %v911_v23, %v3360_v7  ;;  %v1461_v29 = vmax.f32 %v909_v16, 0.0 }
 0x10c   : > { %v1464_v27 = vmax.f32 %v920_v21, 0.0  ;;  %v1458_v28 = vmax.f32 %v823_v22, 0.0 }
 0x10d   : > { %v1490_v30 = vpack.c.bf16 %v1460_v24, %v1459_v15  ;;  %v1462_v31 = vmax.f32 %v912_v25, 0.0 }
 0x10e   : > { %v1492_v32 = vpack.c.bf16 %v1464_v27, %v1463_v20  ;;  %v1489_v33 = vpack.c.bf16 %v1458_v28, %v1457_v26 }
 0x10f   : > { %v1491_v34 = vpack.c.bf16 %v1462_v31, %v1461_v29 }
 0x110   : > { %2758 = vmatpush3.bf16.msra.mxu1 %v1489_v33 }
 0x111   : > { %2759 = vmatprep.subr.bf16.mxu1 %v3076_v1 }
 0x114   : > { %2760 = vmatpush3.bf16.msra.mxu1 %v1490_v30 }
 0x115   : > { %2765 = vmatprep.subr.bf16.mxu1 %v3076_v1 }
 0x116   : > { %v2695_v36 = vpop.f32.mrb[4].mxu0 }
 0x117   : > { %v1006_v37 = vadd.f32 %v2695_v36, %v3354_v3  ;;  %v2707_v38 = vpop.f32.mrb[4].mxu1  ;;  %v997_v39 = vpop.f32.mrb[5].mxu0  ;;  %2762 = vmatmul.mubr.msk.bf16.vlgmr.msra.gmra.mrb[16].mxu1 %vm1519_vm4, %v1505_v35 }
 0x118   : > { %v1095_v40 = vadd.f32 %v2707_v38, %v3354_v3  ;;  %v998_v41 = vadd.f32 %v997_v39, %v3356_v4  ;;  %v1086_v42 = vpop.f32.mrb[5].mxu1  ;;  %v2696_v43 = vpop.f32.mrb[6].mxu0  ;;  %2766 = vmatpush3.bf16.msra.mxu1 %v1491_v34  ;;  %2769 = vmatprep.mubr.msk.bf16.mxu1 %vm3077_vm3, %v3076_v1  ;;  %v1510_v38 = vld [vmem:[%s3638_s8 + $0x14] sm:$0xf] }
 0x119   : > { %v1467_v44 = vmax.f32 %v1006_v37, 0.0  ;;  %v1087_v45 = vadd.f32 %v1086_v42, %v3356_v4  ;;  %v1009_v46 = vadd.f32 %v2696_v43, %v3358_v5  ;;  %v2708_v47 = vpop.f32.mrb[6].mxu1  ;;  %v1000_v48 = vpop.f32.mrb[7].mxu0  ;;  %2767 = vmatprep.subr.bf16.mxu1 %v3076_v1  ;;  %v1509_v37 = vld [vmem:[%s3638_s8 + $0x10] sm:$0xf] }
 0x11a   : > { %v1471_v49 = vmax.f32 %v1095_v40, 0.0  ;;  %v1098_v50 = vadd.f32 %v2708_v47, %v3358_v5  ;;  %v1001_v51 = vadd.f32 %v1000_v48, %v3360_v7  ;;  %v1089_v52 = vpop.f32.mrb[7].mxu1  ;;  %v1465_v55 = vmax.f32 %v998_v41, 0.0 }
 0x11b   : > { %v1468_v53 = vmax.f32 %v1009_v46, 0.0  ;;  %v1090_v54 = vadd.f32 %v1089_v52, %v3360_v7  ;;  %v1469_v59 = vmax.f32 %v1087_v45, 0.0 }
 0x11c   : > { %v1472_v56 = vmax.f32 %v1098_v50, 0.0  ;;  %v1466_v57 = vmax.f32 %v1001_v51, 0.0  ;;  %2768 = vmatpush3.bf16.msra.mxu1 %v1492_v32 }
 0x11d   : > { %v1494_v60 = vpack.c.bf16 %v1468_v53, %v1467_v44  ;;  %v1470_v61 = vmax.f32 %v1090_v54, 0.0  ;;  %2781 = vmatprep.subr.bf16.mxu1 %v3076_v1 }
 0x11e   : > { %v1496_v62 = vpack.c.bf16 %v1472_v56, %v1471_v49  ;;  %v1493_v63 = vpack.c.bf16 %v1466_v57, %v1465_v55 }
 0x11f   : > { %v1495_v0 = vpack.c.bf16 %v1470_v61, %v1469_v59  ;;  %2770 = vmatmul.mubr.msk.bf16.vlgmr.msra.gmra.mrb[20].mxu1 %vm1519_vm4, %v1506_v58 }
 0x120   : > { %2774 = vmatpush3.bf16.msra.mxu0 %v1493_v63  ;;  %2785 = vmatprep.mubr.msk.bf16.mxu1 %vm3077_vm3, %v3076_v1 }
 0x121   : > { %2782 = vmatpush3.bf16.msra.mxu1 %v1495_v0  ;;  %2775 = vmatprep.subr.bf16.mxu0 %v3076_v1 }
 0x122   : > { %2783 = vmatprep.subr.bf16.mxu1 %v3076_v1 }
 0x124   : > { %2776 = vmatpush3.bf16.msra.mxu0 %v1494_v60 }
 0x125   : > { %2784 = vmatpush3.bf16.msra.mxu1 %v1496_v62  ;;  %2789 = vmatprep.subr.bf16.mxu0 %v3076_v1 }
 0x126   : > { %v2719_v9 = vpop.f32.mrb[8].mxu0  ;;  %2797 = vmatprep.subr.bf16.mxu1 %v3076_v1 }
 0x127   : > { %v1184_v10 = vadd.f32 %v2719_v9, %v3354_v3  ;;  %v2731_v11 = vpop.f32.mrb[8].mxu1  ;;  %v1175_v12 = vpop.f32.mrb[9].mxu0  ;;  %2778 = vmatmul.mubr.msk.bf16.vlgmr.msra.gmra.mrb[16].mxu0 %vm1519_vm4, %v1507_v6  ;;  %v1867_v6 = vlaneseq }
 0x128   : > { %v1273_v13 = vadd.f32 %v2731_v11, %v3354_v3  ;;  %v1176_v14 = vadd.f32 %v1175_v12, %v3356_v4  ;;  %v1264_v15 = vpop.f32.mrb[9].mxu1  ;;  %2786 = vmatmul.mubr.msk.bf16.vlgmr.msra.gmra.mrb[24].mxu1 %vm1519_vm4, %v1508_v8  ;;  %v2720_v16 = vpop.f32.mrb[10].mxu0  ;;  %2793 = vmatprep.mubr.msk.bf16.mxu0 %vm3077_vm3, %v3076_v1  ;;  %v1864_v8 = vld [vmem:[%s619_s24] sm:$0x1] }
 0x129   : > { %v1265_v17 = vadd.f32 %v1264_v15, %v3356_v4  ;;  %v1187_v18 = vadd.f32 %v2720_v16, %v3358_v5  ;;  %v2732_v19 = vpop.f32.mrb[10].mxu1  ;;  %v1178_v20 = vpop.f32.mrb[11].mxu0  ;;  %2801 = vmatprep.mubr.msk.bf16.mxu1 %vm3077_vm3, %v3076_v1  ;;  %v1475_v24 = vmax.f32 %v1184_v10, 0.0  ;;  %v1868_v9 = vshrl.u32 %v1867_v6, 7 }
 0x12a   : > { %v1276_v21 = vadd.f32 %v2732_v19, %v3358_v5  ;;  %v1179_v22 = vadd.f32 %v1178_v20, %v3360_v7  ;;  %v1267_v23 = vpop.f32.mrb[11].mxu1  ;;  %v1479_v27 = vmax.f32 %v1273_v13, 0.0  ;;  %v1473_v28 = vmax.f32 %v1176_v14, 0.0  ;;  %v1517_v13 = vpop.permute.xlu0 %1516 }
 0x12b   : > { %v1476_v25 = vmax.f32 %v1187_v18, 0.0  ;;  %v1268_v26 = vadd.f32 %v1267_v23, %v3360_v7  ;;  %v1477_v31 = vmax.f32 %v1265_v17, 0.0  ;;  %vm1865_vm5 = vcmp.gt.f32.partialorder %v1864_v8, 0.5 }
 0x12c   : > { %v1480_v29 = vmax.f32 %v1276_v21, 0.0  ;;  %v1474_v30 = vmax.f32 %v1179_v22, 0.0  ;;  %v1869_v10 = vsub.s32 0, %v1868_v9  ;;  %v1866_v11 = vsel %vm1865_vm5, 1, %v3074_v2 }
 0x12d   : > { %v1498_v32 = vpack.c.bf16 %v1476_v25, %v1475_v24  ;;  %v1478_v33 = vmax.f32 %v1268_v26, 0.0 }
 0x12e   : > { %v1500_v34 = vpack.c.bf16 %v1480_v29, %v1479_v27  ;;  %v1497_v35 = vpack.c.bf16 %v1474_v30, %v1473_v28  ;;  %v3459_v12 = vrot.slane %v1866_v11, %v1869_v10 }
 0x12f   : > { %v1499_v36 = vpack.c.bf16 %v1478_v33, %v1477_v31 }
 0x130   : > { %2790 = vmatpush3.bf16.msra.mxu0 %v1497_v35  ;;  %vm1871_vm6 = vcmp.eq.s32.totalorder %v3459_v12, 1 }
 0x131   : > { %2798 = vmatpush3.bf16.msra.mxu1 %v1499_v36  ;;  %2791 = vmatprep.subr.bf16.mxu0 %v3076_v1 }
 0x132   : > { %2799 = vmatprep.subr.bf16.mxu1 %v3076_v1 }
 0x134   : > { %2792 = vmatpush3.bf16.msra.mxu0 %v1498_v32 }
 0x135   : > { %2800 = vmatpush3.bf16.msra.mxu1 %v1500_v34  ;;  %2805 = vmatprep.subr.bf16.mxu0 %v3076_v1 }
 0x136   : > { %v2743_v39 = vpop.f32.mrb[12].mxu0  ;;  %2813 = vmatprep.subr.bf16.mxu1 %v3076_v1 }
 0x137   : > { %v1362_v40 = vadd.f32 %v2743_v39, %v3354_v3  ;;  %v2755_v41 = vpop.f32.mrb[12].mxu1  ;;  %v1353_v42 = vpop.f32.mrb[13].mxu0  ;;  %2794 = vmatmul.mubr.msk.bf16.vlgmr.msra.gmra.mrb[20].mxu0 %vm1519_vm4, %v1509_v37 }
 0x138   : > { %v1451_v43 = vadd.f32 %v2755_v41, %v3354_v3  ;;  %v1354_v44 = vadd.f32 %v1353_v42, %v3356_v4  ;;  %v1442_v45 = vpop.f32.mrb[13].mxu1  ;;  %2802 = vmatmul.mubr.msk.bf16.vlgmr.msra.gmra.mrb[28].mxu1 %vm1519_vm4, %v1510_v38  ;;  %v2744_v46 = vpop.f32.mrb[14].mxu0  ;;  %2809 = vmatprep.mubr.msk.bf16.mxu0 %vm3077_vm3, %v3076_v1 }
 0x139   : > { %v1443_v47 = vadd.f32 %v1442_v45, %v3356_v4  ;;  %v1365_v48 = vadd.f32 %v2744_v46, %v3358_v5  ;;  %v2756_v49 = vpop.f32.mrb[14].mxu1  ;;  %v1356_v50 = vpop.f32.mrb[15].mxu0  ;;  %2817 = vmatprep.mubr.msk.bf16.mxu1 %vm3077_vm3, %v3076_v1  ;;  %v1483_v53 = vmax.f32 %v1362_v40, 0.0 }
 0x13a   : > { %v1454_v3 = vadd.f32 %v2756_v49, %v3358_v5  ;;  %v1357_v51 = vadd.f32 %v1356_v50, %v3360_v7  ;;  %v1445_v52 = vpop.f32.mrb[15].mxu1  ;;  %v1487_v56 = vmax.f32 %v1451_v43, 0.0  ;;  %v1481_v57 = vmax.f32 %v1354_v44, 0.0  ;;  %v1511_v5 = vld [vmem:[%s3638_s8 + $0x18] sm:$0xf] }
 0x13b   : > { %v1484_v54 = vmax.f32 %v1365_v48, 0.0  ;;  %v1446_v55 = vadd.f32 %v1445_v52, %v3360_v7  ;;  %v1485_v59 = vmax.f32 %v1443_v47, 0.0  ;;  %v1512_v7 = vld [vmem:[%s3638_s8 + $0x1c] sm:$0xf] }
 0x13c   : > { %v1488_v58 = vmax.f32 %v1454_v3, 0.0  ;;  %v1482_v4 = vmax.f32 %v1357_v51, 0.0 }
 0x13d   : > { %v1502_v60 = vpack.c.bf16 %v1484_v54, %v1483_v53  ;;  %v1486_v61 = vmax.f32 %v1446_v55, 0.0 }
 0x13e   : > { %v1504_v62 = vpack.c.bf16 %v1488_v58, %v1487_v56  ;;  %v1501_v63 = vpack.c.bf16 %v1482_v4, %v1481_v57 }
 0x13f   : > { %v1503_v0 = vpack.c.bf16 %v1486_v61, %v1485_v59 }
 0x140   : > { %2806 = vmatpush3.bf16.msra.mxu0 %v1501_v63 }
 0x141   : > { %2814 = vmatpush3.bf16.msra.mxu1 %v1503_v0  ;;  %2807 = vmatprep.subr.bf16.mxu0 %v3076_v1 }
 0x142   : > { %2815 = vmatprep.subr.bf16.mxu1 %v3076_v1 }
 0x144   : > { %2808 = vmatpush3.bf16.msra.mxu0 %v1502_v60 }
 0x145   : > { %2816 = vmatpush3.bf16.msra.mxu1 %v1504_v62 }
 0x147   : > { %2810 = vmatmul.mubr.msk.bf16.vlgmr.msra.gmra.mrb[24].mxu0 %vm1519_vm4, %v1511_v5 }
 0x148   : > { %2818 = vmatmul.mubr.msk.bf16.vlgmr.msra.gmra.mrb[32].mxu1 %vm1519_vm4, %v1512_v7 }
 0x149   : > { %2839 = vmatprep.mubr.msk.f32.mxu1 %vm3077_vm3, %v3076_v1 }
 0x1ea   : > { %v1557_v14 = vpop.f32.mrb[16].mxu1 }
 0x1eb   : > { %v1558_v15 = vadd.f32 %v1557_v14, %v1517_v13  ;;  %v2763_v1 = vpop.f32.mrb[17].mxu1 }
 0x1ec   : > { %v1560_v16 = vpop.f32.mrb[18].mxu1 }
 0x1ed   : > { %v1872_v17 = vsel %vm1871_vm6, %v1558_v15, -inf  ;;  %v2764_v18 = vpop.f32.mrb[19].mxu1 }
 0x1ee   : > { %v1881_v19 = vsel %vm1880_vm7, %v1872_v17, -inf }
 0x1ef   : > { %1882 = vmax.xlane.f32.xlu1 %v1881_v19 }
 0x1f2   : > { %v1600_v20 = vpop.f32.mrb[20].mxu1 }
 0x1f3   : > { %v1601_v21 = vadd.f32 %v1600_v20, %v1517_v13  ;;  %v2771_v22 = vpop.f32.mrb[21].mxu1 }
 0x1f4   : > { %v1603_v23 = vpop.f32.mrb[22].mxu1 }
 0x1f5   : > { %v1873_v24 = vsel %vm1871_vm6, %v1601_v21, -inf  ;;  %v2772_v25 = vpop.f32.mrb[23].mxu1 }
 0x1f6   : > { %v1884_v26 = vsel %vm1880_vm7, %v1873_v24, -inf }
 0x1f7   : > { %1885 = vmax.xlane.f32.xlu0 %v1884_v26 }
 0x1fa   : > { %v1643_v27 = vpop.f32.mrb[16].mxu0 }
 0x1fb   : > { %v1644_v28 = vadd.f32 %v1643_v27, %v1517_v13  ;;  %v1686_v29 = vpop.f32.mrb[24].mxu1  ;;  %v2779_v30 = vpop.f32.mrb[17].mxu0 }
 0x1fc   : > { %v1687_v31 = vadd.f32 %v1686_v29, %v1517_v13  ;;  %v2787_v32 = vpop.f32.mrb[25].mxu1  ;;  %v1646_v33 = vpop.f32.mrb[18].mxu0 }
 0x1fd   : > { %v1874_v34 = vsel %vm1871_vm6, %v1644_v28, -inf  ;;  %v1689_v35 = vpop.f32.mrb[26].mxu1  ;;  %v2780_v36 = vpop.f32.mrb[19].mxu0 }
 0x1fe   : > { %v1887_v37 = vsel %vm1880_vm7, %v1874_v34, -inf  ;;  %v1875_v38 = vsel %vm1871_vm6, %v1687_v31, -inf  ;;  %v2788_v39 = vpop.f32.mrb[27].mxu1 }
 0x1ff   : > { %1888 = vmax.xlane.f32.xlu0 %v1887_v37  ;;  %v1890_v40 = vsel %vm1880_vm7, %v1875_v38, -inf }
 0x200   : > { %1891 = vmax.xlane.f32.xlu1 %v1890_v40 }
 0x20a   : > { %v1729_v41 = vpop.f32.mrb[20].mxu0 }
 0x20b   : > { %v1730_v42 = vadd.f32 %v1729_v41, %v1517_v13  ;;  %v1772_v43 = vpop.f32.mrb[28].mxu1  ;;  %v2795_v44 = vpop.f32.mrb[21].mxu0 }
 0x20c   : > { %v1773_v45 = vadd.f32 %v1772_v43, %v1517_v13  ;;  %v2803_v46 = vpop.f32.mrb[29].mxu1  ;;  %v1732_v47 = vpop.f32.mrb[22].mxu0 }
 0x20d   : > { %v1876_v48 = vsel %vm1871_vm6, %v1730_v42, -inf  ;;  %v1775_v49 = vpop.f32.mrb[30].mxu1  ;;  %v2796_v50 = vpop.f32.mrb[23].mxu0 }
 0x20e   : > { %v1893_v3 = vsel %vm1880_vm7, %v1876_v48, -inf  ;;  %v1877_v51 = vsel %vm1871_vm6, %v1773_v45, -inf  ;;  %v2804_v52 = vpop.f32.mrb[31].mxu1  ;;  %v2001_v50 = vld [vmem:[%s602_s3] sm:$0xf]  ;;  %s605_s3 = scalar_lea.vmem %s3661_s2, %s3223_s29  ;;  %s589_s29 = sand.u32 1, %s3056_s19  }
 0x20f   : > { %1894 = vmax.xlane.f32.xlu0 %v1893_v3  ;;  %v1896_v53 = vsel %vm1880_vm7, %v1877_v51, -inf  ;;  %2848 = vmatprep.subr.msk.bf16.mxu0 %vm2034_vm8, %v2001_v50  ;;  %v2036_v3 = vsel %vm2034_vm8, %v2001_v50, 0  ;;  %s2481_s27 = sshll.u32 %s589_s29, 3 }
 0x210   : > { %1897 = vmax.xlane.f32.xlu1 %v1896_v53  ;;  %2822 = vmatpush3.bf16.msra.mxu0 %v2036_v3  ;;  %s591_s25 = scalar_lea.vmem [#allocation2], %s2481_s27 }
 0x211   : > { %s2339_s1 = sshll.u32 %s591_s25, 4  ;;  %s3584_s1 = int_to_ptr.vmem [resolvable:$true] %s2339_s1 }
 0x212   : > { %s2994_s17 = scalar_lea.vmem %s3584_s1, 128 }
 0x213   : > { %p2995_p12 = scmp.ne.s32.totalorder %s3584_s1, %s2994_s17 }
 0x215   : > { %p2996_p13 = pnand %p2995_p12, %p3200_p4 }
 0x217   : > { %p2997_p0 = pneg %p2996_p13 }
 0x21a   : > { %v1815_v54 = vpop.f32.mrb[24].mxu0 }
 0x21b   : > { %v1816_v55 = vadd.f32 %v1815_v54, %v1517_v13  ;;  %v1858_v56 = vpop.f32.mrb[32].mxu1  ;;  %v2811_v57 = vpop.f32.mrb[25].mxu0 }
 0x21c   : > { %v1859_v58 = vadd.f32 %v1858_v56, %v1517_v13  ;;  %v2819_v4 = vpop.f32.mrb[33].mxu1  ;;  %v1818_v59 = vpop.f32.mrb[26].mxu0 }
 0x21d   : > { %v1861_v60 = vpop.f32.mrb[34].mxu1  ;;  %v2812_v61 = vpop.f32.mrb[27].mxu0  ;;  %v1878_v62 = vsel %vm1871_vm6, %v1816_v55, -inf  ;;  %v2168_v55 = vld [vmem:[%s626_s26] sm:$0xff] }
 0x21e   : > { %v2820_v63 = vpop.f32.mrb[35].mxu1  ;;  %v1899_v0 = vsel %vm1880_vm7, %v1878_v62, -inf  ;;  %v1879_v5 = vsel %vm1871_vm6, %v1859_v58, -inf  ;;  %vm2169_vm9 = vcmp.lt.f32.partialorder %v2168_v55, 0.5 }
 0x21f   : > { %1900 = vmax.xlane.f32.xlu0 %v1899_v0  ;;  %v1902_v7 = vsel %vm1880_vm7, %v1879_v5, -inf  ;;  %v2171_v56 = vsel %vm2169_vm9, 1, %v3074_v2 }
 0x220   : > { %1903 = vmax.xlane.f32.xlu1 %v1902_v7 }
 0x27c   : > { %v1883_v6 = vpop.xlane.xlu1 %1882 }
 0x27d   : > { %v1905_v8 = vmax.f32 %v1883_v6, -1e+30 }
 0x27f   : > { %v1913_v9 = vsub.f32 %v1872_v17, %v1905_v8 }
 0x281   : > { %v1921_v10 = vmul.f32 1.442695, %v1913_v9 }
 0x283   : > { %2960 = vpow2.f32 %v1921_v10 }
 0x284   : > { %v1886_v11 = vpop.xlane.xlu0 %1885 }
 0x285   : > { %v1906_v13 = vmax.f32 %v1886_v11, -1e+30 }
 0x287   : > { %v1914_v14 = vsub.f32 %v1873_v24, %v1906_v13 }
 0x289   : > { %v1923_v15 = vmul.f32 1.442695, %v1914_v14 }
 0x28b   : > { %2962 = vpow2.f32 %v1923_v15 }
 0x28c   : > { %v1889_v1 = vpop.xlane.xlu0 %1888 }
 0x28d   : > { %v3486_v16 = vpop.eup %2960  ;;  %v1907_v18 = vmax.f32 %v1889_v1, -1e+30  ;;  %v1892_v12 = vpop.xlane.xlu1 %1891 }
 0x28e   : > { %v1908_v19 = vmax.f32 %v1892_v12, -1e+30  ;;  %v1937_v20 = vsel %vm1880_vm7, %v3486_v16, 0.0 }
 0x28f   : > { %v1915_v21 = vsub.f32 %v1874_v34, %v1907_v18  ;;  %1938 = vadd.xlane.f32.xlu0 %v1937_v20 }
 0x290   : > { %v1916_v22 = vsub.f32 %v1875_v38, %v1908_v19 }
 0x291   : > { %v1925_v17 = vmul.f32 1.442695, %v1915_v21 }
 0x292   : > { %v1927_v23 = vmul.f32 1.442695, %v1916_v22 }
 0x293   : > { %2964 = vpow2.f32 %v1925_v17 }
 0x294   : > { %2966 = vpow2.f32 %v1927_v23 }
 0x295   : > { %v3490_v25 = vpop.eup %2962 }
 0x296   : > { %v1940_v24 = vsel %vm1880_vm7, %v3490_v25, 0.0 }
 0x297   : > { %1941 = vadd.xlane.f32.xlu1 %v1940_v24 }
 0x29c   : > { %v1895_v26 = vpop.xlane.xlu0 %1894 }
 0x29d   : > { %v3494_v27 = vpop.eup %2964  ;;  %v1909_v28 = vmax.f32 %v1895_v26, -1e+30  ;;  %v1898_v29 = vpop.xlane.xlu1 %1897 }
 0x29e   : > { %v3496_v30 = vpop.eup %2966  ;;  %v1910_v31 = vmax.f32 %v1898_v29, -1e+30  ;;  %v1943_v32 = vsel %vm1880_vm7, %v3494_v27, 0.0 }
 0x29f   : > { %v1917_v33 = vsub.f32 %v1876_v48, %v1909_v28  ;;  %1944 = vadd.xlane.f32.xlu0 %v1943_v32  ;;  %v1946_v34 = vsel %vm1880_vm7, %v3496_v30, 0.0 }
 0x2a0   : > { %v1918_v35 = vsub.f32 %v1877_v51, %v1910_v31  ;;  %1947 = vadd.xlane.f32.xlu1 %v1946_v34  ;;  %v2208_v31 = vld [vmem:[%s3641_s11 + $0x8] sm:$0xff]  ;;  %v2209_v34 = vld [vmem:[%s3641_s11 + $0x10] sm:$0xff] }
 0x2a1   : > { %v1929_v36 = vmul.f32 1.442695, %v1917_v33  ;;  %v3078_v33 = vmov 0.0|0.0  }
 0x2a2   : > { %v1931_v37 = vmul.f32 1.442695, %v1918_v35  ;;  %2842 = vmatprep.subr.bf16.mxu1 %v3078_v33  ;;  %v2210_v35 = vld [vmem:[%s3641_s11 + $0x18] sm:$0xff] }
 0x2a3   : > { %2968 = vpow2.f32 %v1929_v36  ;;  %v2846_v36 = vpack.c.bf16 %v2210_v35, %v2209_v34 }
 0x2a4   : > { %2970 = vpow2.f32 %v1931_v37  ;;  %v2103_v37 = vld [vmem:[%s3640_s10] sm:$0xff] }
 0x2ac   : > { %v1901_v38 = vpop.xlane.xlu0 %1900 }
 0x2ad   : > { %v3502_v39 = vpop.eup %2968  ;;  %v1911_v40 = vmax.f32 %v1901_v38, -1e+30  ;;  %v1904_v41 = vpop.xlane.xlu1 %1903 }
 0x2ae   : > { %v3504_v42 = vpop.eup %2970  ;;  %v1912_v43 = vmax.f32 %v1904_v41, -1e+30  ;;  %v1949_v44 = vsel %vm1880_vm7, %v3502_v39, 0.0 }
 0x2af   : > { %v1919_v45 = vsub.f32 %v1878_v62, %v1911_v40  ;;  %1950 = vadd.xlane.f32.xlu0 %v1949_v44  ;;  %v1952_v46 = vsel %vm1880_vm7, %v3504_v42, 0.0 }
 0x2b0   : > { %v1920_v47 = vsub.f32 %v1879_v5, %v1912_v43  ;;  %1953 = vadd.xlane.f32.xlu1 %v1952_v46 }
 0x2b1   : > { %v1933_v48 = vmul.f32 1.442695, %v1919_v45 }
 0x2b2   : > { %v1935_v49 = vmul.f32 1.442695, %v1920_v47 }
 0x2b3   : > { %2972 = vpow2.f32 %v1933_v48 }
 0x2b4   : > { %2974 = vpow2.f32 %v1935_v49 }
 0x2bd   : > { %v2973_v51 = vpop.eup %2972 }
 0x2be   : > { %v2975_v52 = vpop.eup %2974  ;;  %v1955_v53 = vsel %vm1880_vm7, %v2973_v51, 0.0 }
 0x2bf   : > { %1956 = vadd.xlane.f32.xlu0 %v1955_v53  ;;  %v1958_v54 = vsel %vm1880_vm7, %v2975_v52, 0.0 }
 0x2c0   : > { %1959 = vadd.xlane.f32.xlu1 %v1958_v54 }
 0x2d5   : > { %2173 = vperm.xlu0 %2910, %v2171_v56  }
 0x31c   : > { %v1939_v57 = vpop.xlane.xlu0 %1938 }
 0x31d   : > { %v1961_v58 = vmax.f32 %v1939_v57, 1e-30 }
 0x31f   : > { %2976 = vrcp.f32 %v1961_v58 }
 0x324   : > { %v1942_v4 = vpop.xlane.xlu1 %1941 }
 0x325   : > { %v1962_v59 = vmax.f32 %v1942_v4, 1e-30 }
 0x327   : > { %2978 = vrcp.f32 %v1962_v59 }
 0x329   : > { %v2977_v0 = vpop.eup %2976 }
 0x32a   : > { %v1985_v7 = vmul.f32 %v2977_v0, %v3486_v16 }
 0x32c   : > { %v1945_v60 = vpop.xlane.xlu0 %1944 }
 0x32d   : > { %v1963_v61 = vmax.f32 %v1945_v60, 1e-30  ;;  %v1948_v62 = vpop.xlane.xlu1 %1947 }
 0x32e   : > { %v1964_v63 = vmax.f32 %v1948_v62, 1e-30 }
 0x32f   : > { %2980 = vrcp.f32 %v1963_v61 }
 0x330   : > { %2982 = vrcp.f32 %v1964_v63 }
 0x331   : > { %v2979_v5 = vpop.eup %2978 }
 0x332   : > { %v1986_v6 = vmul.f32 %v2979_v5, %v3490_v25 }
 0x334   : > { %v2575_v2 = vpack.c.bf16 %v1986_v6, %v1985_v7 }
 0x336   : > { %2823 = vmatprep.mubr.msk.bf16.mxu0 %vm1880_vm7, %v2575_v2 }
 0x339   : > { %v2981_v8 = vpop.eup %2980 }
 0x33a   : > { %v2983_v9 = vpop.eup %2982  ;;  %v1987_v10 = vmul.f32 %v2981_v8, %v3494_v27 }
 0x33b   : > { %v1988_v11 = vmul.f32 %v2983_v9, %v3496_v30  ;;  %v2207_v30 = vld [vmem:[%s3641_s11] sm:$0xff] }
 0x33c   : > { %v1951_v13 = vpop.xlane.xlu0 %1950  ;;  %v2843_v32 = vpack.c.bf16 %v2208_v31, %v2207_v30 }
 0x33d   : > { %v1965_v14 = vmax.f32 %v1951_v13, 1e-30  ;;  %v1954_v15 = vpop.xlane.xlu1 %1953  ;;  %v2576_v1 = vpack.c.bf16 %v1988_v11, %v1987_v10 }
 0x33e   : > { %v1966_v18 = vmax.f32 %v1954_v15, 1e-30  ;;  %2844 = vmatpush3.bf16.msra.mxu1 %v2843_v32 }
 0x33f   : > { %2984 = vrcp.f32 %v1965_v14  ;;  %2824 = vmatmul.mubr.msk.bf16.vlgmr.msra.gmra.mrb[28].mxu0 %vm1880_vm7, %v2576_v1  ;;  %2845 = vmatprep.subr.bf16.mxu1 %v3078_v33 }
 0x340   : > { %2986 = vrcp.f32 %v1966_v18 }
 0x342   : > { %2847 = vmatpush3.bf16.msra.mxu1 %v2846_v36 }
 0x349   : > { %v2985_v16 = vpop.eup %2984 }
 0x34a   : > { %v2987_v12 = vpop.eup %2986  ;;  %v1989_v19 = vmul.f32 %v2985_v16, %v3502_v39 }
 0x34b   : > { %v1990_v20 = vmul.f32 %v2987_v12, %v3504_v42 }
 0x34c   : > { %v1957_v21 = vpop.xlane.xlu0 %1956 }
 0x34d   : > { %v1967_v22 = vmax.f32 %v1957_v21, 1e-30  ;;  %v1960_v17 = vpop.xlane.xlu1 %1959  ;;  %v2577_v23 = vpack.c.bf16 %v1990_v20, %v1989_v19 }
 0x34e   : > { %v1968_v25 = vmax.f32 %v1960_v17, 1e-30 }
 0x34f   : > { %2988 = vrcp.f32 %v1967_v22  ;;  %2827 = vmatprep.mubr.msk.bf16.mxu0 %vm1880_vm7, %v2577_v23 }
 0x350   : > { %2990 = vrcp.f32 %v1968_v25 }
 0x359   : > { %v2989_v24 = vpop.eup %2988 }
 0x35a   : > { %v2991_v26 = vpop.eup %2990  ;;  %v1991_v27 = vmul.f32 %v2989_v24, %v2973_v51 }
 0x35b   : > { %v1992_v28 = vmul.f32 %v2991_v26, %v2975_v52 }
 0x35d   : > { %v2578_v29 = vpack.c.bf16 %v1992_v28, %v1991_v27 }
 0x35f   : > { %2828 = vmatmul.mubr.msk.bf16.gmra.mrb[32].mxu0 %vm1880_vm7, %v2578_v29 }
 0x412   : > { %v2825_v38 = vpop.f32.mrb[28].mxu0 }
 0x413   : > { %v2106_v39 = vmul.f32 %v2825_v38, %v2103_v37  ;;  %v2072_v40 = vpop.f32.mrb[29].mxu0 }
 0x414   : > { %v2104_v41 = vmul.f32 %v2103_v37, %v2072_v40  ;;  %v2826_v42 = vpop.f32.mrb[30].mxu0 }
 0x415   : > { %v2126_v43 = vsel %vm1519_vm4, %v2106_v39, 0.0  ;;  %v2107_v44 = vmul.f32 %v2826_v42, %v2103_v37  ;;  %v2075_v45 = vpop.f32.mrb[31].mxu0 }
 0x416   : > { %v2127_v46 = vrot.slane %v2126_v43, 4  ;;  %v2112_v47 = vsel %vm1519_vm4, %v2104_v41, 0.0  ;;  %v2105_v48 = vmul.f32 %v2103_v37, %v2075_v45 }
 0x417   : > { %v2113_v49 = vrot.slane %v2112_v47, 4  ;;  %v2133_v50 = vsel %vm1519_vm4, %v2107_v44, 0.0 }
 0x418   : > { %v2128_v3 = vadd.f32 %v2127_v46, %v2126_v43  ;;  %v2134_v51 = vrot.slane %v2133_v50, 4  ;;  %v2119_v52 = vsel %vm1519_vm4, %v2105_v48, 0.0  ;;  %v2174_v48 = vpop.permute.xlu0 %2173 }
 0x419   : > { %v2114_v53 = vadd.f32 %v2113_v49, %v2112_v47  ;;  %v2120_v54 = vrot.slane %v2119_v52, 4  ;;  %vm2175_vm1 = vcmp.eq.s32.totalorder %v2174_v48, 1 }
 0x41a   : > { %v2129_v55 = vrot.slane %v2128_v3, 2  ;;  %v2135_v56 = vadd.f32 %v2134_v51, %v2133_v50  ;;  %v2566_v51 = vld [vmem:[%s605_s3] ss:$0 sm:$0xff]  ;;  %s2325_s3 = scalar_lea.sflag [#allocation3], %s589_s29 }
 0x41b   : > { %v2115_v57 = vrot.slane %v2114_v53, 2  ;;  %v2121_v58 = vadd.f32 %v2120_v54, %v2119_v52 }
 0x41c   : > { %v2130_v4 = vadd.f32 %v2129_v55, %v2128_v3  ;;  %v2136_v59 = vrot.slane %v2135_v56, 2  ;;  %v2206_v55 = vld [vmem:[%s598_s22] sm:$0xff]  ;;  %s2572_s22 = sshll.u32 %s3064_s21, 7  ;;  %s3079_s21 = smov [#allocation2]  }
 0x41d   : > { %v2116_v60 = vadd.f32 %v2115_v57, %v2114_v53  ;;  %v2122_v61 = vrot.slane %v2121_v58, 2  ;;  %v2568_v57 = vld [vmem:[%s3642_s12] ss:$0 sm:$0xff]  ;;  %s3582_s4 = scalar_lea.hbm %s3645_s15, %s2572_s22  ;;  %s2998_s27 = sshll.u32 %s3079_s21, 4  ;;  %s2999_s27 = int_to_ptr.vmem [resolvable:$false] %s2998_s27 }
 0x41e   : > { %v2137_v62 = vadd.f32 %v2136_v59, %v2135_v56  ;;  %v2131_v5 = vrot.slane %v2130_v4, 1  ;;  %s3000_s24 = scalar_lea.vmem %s2999_s27, 256  ;;  %p3001_p1 = scmp.lt.s32.totalorder %s3584_s1, %s2999_s27 }
 0x41f   : > { %v2117_v63 = vrot.slane %v2116_v60, 1  ;;  %v2123_v0 = vadd.f32 %v2122_v61, %v2121_v58  ;;  %p3002_p2 = scmp.lt.s32.totalorder %s3000_s24, %s2994_s17 }
 0x420   : > { %v2138_v7 = vrot.slane %v2137_v62, 1  ;;  %v2132_v9 = vadd.f32 %v2131_v5, %v2130_v4 }
 0x421   : > { %v2124_v6 = vrot.slane %v2123_v0, 1  ;;  %v2118_v2 = vadd.f32 %v2117_v63, %v2116_v60  ;;  %p3003_p3 = por %p3002_p2, %p3001_p1 }
 0x422   : > { %v2139_v10 = vadd.f32 %v2138_v7, %v2137_v62 }
 0x423   : > { %v2125_v8 = vadd.f32 %v2124_v6, %v2123_v0  ;;  %p3004_p5 = pnand %p3003_p3, %p2997_p0 }
 0x425   : > { %v2191_v11 = vsel %vm2190_vm10, %v2125_v8, %v2118_v2 }
 0x426   : > { %v2193_v13 = vsel %vm2192_vm11, %v2132_v9, %v2191_v11  ;;  %v2569_v9 = vld [vmem:[%s3643_s13] ss:$0 sm:$0xff] }
 0x427   : > { %v2195_v14 = vsel %vm2194_vm12, %v2139_v10, %v2193_v13  ;;  %v2570_v11 = vld [vmem:[%s3644_s14] ss:$0 sm:$0xff] }
 0x432   : > { %v2829_v15 = vpop.f32.mrb[32].mxu0 }
 0x433   : > { %v2110_v1 = vmul.f32 %v2829_v15, %v2103_v37  ;;  %v2088_v18 = vpop.f32.mrb[33].mxu0 }
 0x434   : > { %v2108_v16 = vmul.f32 %v2103_v37, %v2088_v18  ;;  %v2830_v12 = vpop.f32.mrb[34].mxu0 }
 0x435   : > { %v2154_v19 = vsel %vm1519_vm4, %v2110_v1, 0.0  ;;  %v2111_v20 = vmul.f32 %v2830_v12, %v2103_v37  ;;  %v2091_v21 = vpop.f32.mrb[35].mxu0 }
 0x436   : > { %v2155_v22 = vrot.slane %v2154_v19, 4  ;;  %v2140_v17 = vsel %vm1519_vm4, %v2108_v16, 0.0  ;;  %v2109_v23 = vmul.f32 %v2103_v37, %v2091_v21 }
 0x437   : > { %v2141_v25 = vrot.slane %v2140_v17, 4  ;;  %v2161_v24 = vsel %vm1519_vm4, %v2111_v20, 0.0 }
 0x438   : > { %v2156_v26 = vadd.f32 %v2155_v22, %v2154_v19  ;;  %v2162_v27 = vrot.slane %v2161_v24, 4  ;;  %v2147_v28 = vsel %vm1519_vm4, %v2109_v23, 0.0 }
 0x439   : > { %v2142_v29 = vadd.f32 %v2141_v25, %v2140_v17  ;;  %v2148_v30 = vrot.slane %v2147_v28, 4 }
 0x43a   : > { %v2157_v31 = vrot.slane %v2156_v26, 2  ;;  %v2163_v32 = vadd.f32 %v2162_v27, %v2161_v24 }
 0x43b   : > { %v2143_v33 = vrot.slane %v2142_v29, 2  ;;  %v2149_v34 = vadd.f32 %v2148_v30, %v2147_v28 }
 0x43c   : > { %v2158_v35 = vadd.f32 %v2157_v31, %v2156_v26  ;;  %v2164_v36 = vrot.slane %v2163_v32, 2 }
 0x43d   : > { %v2144_v38 = vadd.f32 %v2143_v33, %v2142_v29  ;;  %v2150_v39 = vrot.slane %v2149_v34, 2 }
 0x43e   : > { %v2165_v40 = vadd.f32 %v2164_v36, %v2163_v32  ;;  %v2159_v42 = vrot.slane %v2158_v35, 1 }
 0x43f   : > { %v2145_v37 = vrot.slane %v2144_v38, 1  ;;  %v2151_v41 = vadd.f32 %v2150_v39, %v2149_v34 }
 0x440   : > { %v2166_v44 = vrot.slane %v2165_v40, 1  ;;  %v2160_v49 = vadd.f32 %v2159_v42, %v2158_v35 }
 0x441   : > { %v2146_v43 = vadd.f32 %v2145_v37, %v2144_v38  ;;  %v2152_v45 = vrot.slane %v2151_v41, 1 }
 0x442   : > { %v2167_v50 = vadd.f32 %v2166_v44, %v2165_v40 }
 0x443   : > { %v2197_v46 = vsel %vm2196_vm13, %v2146_v43, %v2195_v14  ;;  %v2153_v47 = vadd.f32 %v2152_v45, %v2151_v41 }
 0x445   : > { %v2199_v3 = vsel %vm2198_vm14, %v2153_v47, %v2197_v46 }
 0x446   : > { %v2201_v52 = vsel %vm2200_vm15, %v2160_v49, %v2199_v3 }
 0x447   : > { %v2203_v53 = vsel %vm2202_vm0, %v2167_v50, %v2201_v52 }
 0x448   : > { %v2205_v54 = vsel %vm2175_vm1, %v2566_v51, %v2203_v53 }
 0x449   : > { %2840 = vmatmul.mubr.msk.f32.vlgmr.msra.gmra.mrb[36].mxu1 %vm1519_vm4, %v2205_v54 }
 0x51c   : > { %v2280_v56 = vpop.f32.mrb[36].mxu1 }
 0x51d   : > { %v2284_v58 = vadd.f32 %v2280_v56, %v2206_v55  ;;  %v2841_v4 = vpop.f32.mrb[37].mxu1 }
 0x51f   : > { %v2292_v59 = vadd.f32 %v2568_v57, %v2284_v58 }
 0x521   : > { %v2293_v60 = vsel %vm1519_vm4, %v2292_v59, 0.0 }
 0x522   : > { %2294 = vadd.xlane.f32.xlu1 %v2293_v60 }
 0x5af   : > { %v2295_v61 = vpop.xlane.xlu1 %2294 }
 0x5b0   : > { %v2297_v62 = vmul.f32 0.03125, %v2295_v61 }
 0x5b2   : > { %v2298_v63 = vsub.f32 %v2292_v59, %v2297_v62 }
 0x5b4   : > { %v2299_v0 = vmul.f32 %v2298_v63, %v2298_v63 }
 0x5b6   : > { %v2300_v5 = vsel %vm1519_vm4, %v2299_v0, 0.0 }
 0x5b7   : > { %2301 = vadd.xlane.f32.xlu1 %v2300_v5 }
 0x644   : > { %v2302_v7 = vpop.xlane.xlu1 %2301 }
 0x645   : > { %v2303_v6 = vmul.f32 0.03125, %v2302_v7 }
 0x647   : > { %v2304_v2 = vadd.f32 1e-05, %v2303_v6 }
 0x649   : > { %2992 = vrsqrt.f32 %v2304_v2 }
 0x653   : > { %v2993_v8 = vpop.eup %2992 }
 0x654   : > { %v2306_v10 = vmul.f32 %v2993_v8, %v2298_v63 }
 0x656   : > { %v2314_v13 = vmul.f32 %v2569_v9, %v2306_v10 }
 0x658   : > { %v2322_v14 = vadd.f32 %v2570_v11, %v2314_v13 }
 0x65a   : > { %2323 = vst.msk [vmem:[%s591_s25] sm:$0xff] %vm1519_vm4, %v2322_v14 }
 0x65b   : > { %3007 = shalt.err (!%p3004_p5)
}
 0x65c   : > { %s3008_s0 = scalar_lea.hbm %s3582_s4, 128  ;;  %s3012_s26 = scalar_lea.hbm %s3645_s15, 256 }
 0x65d   : > { %p3009_p6 = scmp.ne.s32.totalorder %s3582_s4, %s3008_s0  ;;  %p3013_p10 = scmp.lt.u32.totalorder %s3582_s4, %s3645_s15 }
 0x65e   : > { %p3014_p11 = scmp.lt.u32.totalorder %s3012_s26, %s3008_s0  ;;  %p3016_p13 = scmp.lt.u32.totalorder %s3008_s0, %s3582_s4 }
 0x65f   : > { %p3010_p7 = pnand %p3009_p6, %p3200_p4 }
 0x660   : > { %p3015_p12 = por %p3014_p11, %p3013_p10 }
 0x661   : > { %p3011_p9 = pneg %p3010_p7 }
 0x662   : > { %p3017_p0 = por %p3016_p13, %p3015_p12 }
 0x664   : > { %p3018_p1 = pnand %p3017_p0, %p3011_p9 }
 0x666   : > { %3021 = shalt.err (!%p3018_p1)
}
 0x667   : > { %2850 = dma.vmem_to_hbm [thread:$0]  (%p3200_p4), %s3584_s1, 128, %s3582_s4, %s2325_s3  }
 0x668 PF: > { %p2856_p2 = scmp.ge.s32.totalorder %s3072_s23, 2  ;;  %s2351_s17 = sand.u32 1, %s3052_s18  }
 0x669   : > { %s2352_s21 = scalar_lea.sflag [#allocation3], %s2351_s17 }
 0x66a   : > { %p2853_p3 = pnand %p2856_p2, %p3207_p8 }
 0x66c   : > { %3047 = dma.done.wait (!%p2853_p3), %s2352_s21, 128  }
 0x66d   : > { %3049 = vsyncadd (!%p2853_p3), %s2352_s21, 4294967168  ;;  %s28_s23 = sadd.s32 1, %s3072_s23   ;;  %s3664_s21 = sld [smem:[#allocation5_spill]] }
 0x66e   : > { %p25_p5 = scmp.ge.s32.totalorder %s28_s23, 4   ;;  %s3665_s22 = sld [smem:[#allocation6_spill]] }
 0x66f   : > { %s3666_s18 = smov %s3056_s19  ;;  %s3667_s19 = smov %s3060_s20 }
 0x670   : > { %s3668_s20 = smov %s3213_s16  ;;  %27 = sbr.rel (!%p25_p5) target bundleno = 10 (0xa), region = 130 }
 0x677   :  { %2357 = vsyncpa [#allocation3], 1 }
 0x678   :  { %2359 = vsyncpa [#allocation3 + $0x1], 1 }

</bundles_post_ra>
